<compile_context>
chip_gen: v7x
topology: tpu7x:2x2x1
jax: 0.10.0
libtpu: 0.0.40
codegen_flags: <defaults>
</compile_context>

<pallas_src>
import math
import numpy as np
import jax
import jax.numpy as jnp
from jax.experimental import pallas as pl
from jax.experimental.pallas import tpu as pltpu


# -------------------- model hyperparameters (small, deterministic) ----------
VOCAB = 50        # num_embeddings
VOCAB_PAD = 56    # padded to a multiple of 8 sublanes
D_MODEL = 32      # d_model
NHEAD = 4         # nhead
HEAD_DIM = D_MODEL // NHEAD
D_FF = 64         # dim_feedforward
SEQ = 8           # sequence length
BATCH = 2         # batch size
N_ROWS = BATCH * SEQ   # rows of the flattened (B*S, D) activation slab
LN_EPS = 1e-5
NEG_INF = -1e9

# -------------------- weight-slab row offsets (all multiples of 8) ----------
EMB_OFF = 0                         # (VOCAB_PAD, D) embedding table (zero padded)
PE_OFF = EMB_OFF + VOCAB_PAD        # (N_ROWS, D)    positional encoding, batch-tiled
SA_WQ_OFF = PE_OFF + N_ROWS         # each weight block below: (D, D)
SA_WK_OFF = SA_WQ_OFF + D_MODEL
SA_WV_OFF = SA_WK_OFF + D_MODEL
SA_WO_OFF = SA_WV_OFF + D_MODEL
CA_WQ_OFF = SA_WO_OFF + D_MODEL
CA_WK_OFF = CA_WQ_OFF + D_MODEL
CA_WV_OFF = CA_WK_OFF + D_MODEL
CA_WO_OFF = CA_WV_OFF + D_MODEL
FF_W1A_OFF = CA_WO_OFF + D_MODEL    # x @ w1.T, first 32 hidden lanes
FF_W1B_OFF = FF_W1A_OFF + D_MODEL   # x @ w1.T, second 32 hidden lanes
FF_W2A_OFF = FF_W1B_OFF + D_MODEL   # w2.T rows for first 32 hidden lanes
FF_W2B_OFF = FF_W2A_OFF + D_MODEL   # w2.T rows for second 32 hidden lanes
SMALL_OFF = FF_W2B_OFF + D_MODEL    # (SMALL_ROWS, D) biases + LayerNorm params
SMALL_ROWS = 24                     # 17 used, padded to a multiple of 8
TOTAL_ROWS = SMALL_OFF + SMALL_ROWS  # 480

# rows inside the small-parameter block
(R_SA_BQ, R_SA_BK, R_SA_BV, R_SA_BO,
 R_CA_BQ, R_CA_BK, R_CA_BV, R_CA_BO,
 R_FF_B1A, R_FF_B1B, R_FF_B2,
 R_LN1_G, R_LN1_B, R_LN2_G, R_LN2_B, R_LN3_G, R_LN3_B) = range(17)


# -------------------- shared math helper (reference) -------------------------
def _layer_norm(x, gamma, beta, eps=LN_EPS):
    mean = jnp.mean(x, axis=-1, keepdims=True)
    var = jnp.mean((x - mean) ** 2, axis=-1, keepdims=True)
    return (x - mean) * jax.lax.rsqrt(var + eps) * gamma + beta


# -------------------- the Pallas kernel: whole batch, one invocation --------
def gpt2_decoder_kernel(meta_ref, w_ref, out_ref):
    f32 = jnp.float32
    n, d = N_ROWS, D_MODEL
    scale = 1.0 / math.sqrt(HEAD_DIM)

    # ---- unpack the tiny int metadata slab ----------------------------------
    head_blk = meta_ref[0:n, :]          # (N, N) int32: lane0 = token id, lane1 = row batch id
    tail_blk = meta_ref[n:n + 8, :]      # (8, N) int32: row0 = pad flags, row1 = key batch id
    tok = head_blk[:, 0:1]               # (N, 1)
    row_b = head_blk[:, 1:2]             # (N, 1)
    pad = tail_blk[0:1, :]               # (1, N)  1 = padded key position
    col_b = tail_blk[1:2, :]             # (1, N)

    # ---- embedding gather as a one-hot MXU matmul + positional encoding -----
    onehot = (tok == jax.lax.broadcasted_iota(jnp.int32, (n, VOCAB_PAD), 1)).astype(f32)
    x = jnp.dot(onehot, w_ref[EMB_OFF:EMB_OFF + VOCAB_PAD, :],
                preferred_element_type=f32)
    x = x + w_ref[PE_OFF:PE_OFF + n, :]
    mem = x                              # encoder output == tgt == memory

    # ---- additive attention mask: block-diagonal batches + key padding ------
    valid = (row_b == col_b) & (pad == 0)                       # (N, N) bool
    add_mask = jnp.where(valid, 0.0, NEG_INF).astype(f32)       # (N, N)

    # ---- per-head lane masks (avoid lane-offset slices / reshapes) ----------
    lane = jax.lax.broadcasted_iota(jnp.int32, (1, d), 1)
    head_masks = [((lane >= h * HEAD_DIM) & (lane < (h + 1) * HEAD_DIM)).astype(f32)
                  for h in range(NHEAD)]

    small = w_ref[SMALL_OFF:SMALL_OFF + SMALL_ROWS, :]          # (24, D)

    def srow(i):
        return small[i:i + 1, :]

    def wmat(off):
        return w_ref[off:off + D_MODEL, :]

    def layer_norm(y, g_i, b_i):
        mu = jnp.mean(y, axis=-1, keepdims=True)
        var = jnp.mean((y - mu) ** 2, axis=-1, keepdims=True)
        return (y - mu) * jax.lax.rsqrt(var + LN_EPS) * srow(g_i) + srow(b_i)

    def mha(xq, xkv, wq_o, wk_o, wv_o, wo_o, bq_i, bk_i, bv_i, bo_i):
        # fused 2-D projections (one MXU matmul each, no head batching)
        q = jnp.dot(xq, wmat(wq_o), preferred_element_type=f32) + srow(bq_i)
        k = jnp.dot(xkv, wmat(wk_o), preferred_element_type=f32) + srow(bk_i)
        v = jnp.dot(xkv, wmat(wv_o), preferred_element_type=f32) + srow(bv_i)
        ctx = jnp.zeros((n, d), f32)
        for hm in head_masks:            # static 4-way unroll, all 2-D matmuls
            # (q * hm) contracts only head-h lanes -> per-head scores (N, N)
            s = jnp.einsum("nd,md->nm", q * hm, k,
                           preferred_element_type=f32) * scale + add_mask
            s = s - jnp.max(s, axis=-1, keepdims=True)
            p = jnp.exp(s)
            p = p * pl.reciprocal(jnp.sum(p, axis=-1, keepdims=True), approx=True)
            # (v * hm) keeps head-h lanes -> context lands in its own lane slot
            ctx = ctx + jnp.dot(p, v * hm, preferred_element_type=f32)
        # heads already concatenated along lanes -> single fused output proj
        return jnp.dot(ctx, wmat(wo_o), preferred_element_type=f32) + srow(bo_i)

    # --- self-attention block + residual + norm1 ---
    sa = mha(x, x, SA_WQ_OFF, SA_WK_OFF, SA_WV_OFF, SA_WO_OFF,
             R_SA_BQ, R_SA_BK, R_SA_BV, R_SA_BO)
    x = layer_norm(x + sa, R_LN1_G, R_LN1_B)

    # --- cross-attention block (memory = encoder output) + norm2 ---
    ca = mha(x, mem, CA_WQ_OFF, CA_WK_OFF, CA_WV_OFF, CA_WO_OFF,
             R_CA_BQ, R_CA_BK, R_CA_BV, R_CA_BO)
    x = layer_norm(x + ca, R_LN2_G, R_LN2_B)

    # --- feed-forward (ReLU), hidden dim split into two 32-lane halves ---
    h1 = jnp.maximum(jnp.dot(x, wmat(FF_W1A_OFF), preferred_element_type=f32)
                     + srow(R_FF_B1A), 0.0)
    h2 = jnp.maximum(jnp.dot(x, wmat(FF_W1B_OFF), preferred_element_type=f32)
                     + srow(R_FF_B1B), 0.0)
    ff = (jnp.dot(h1, wmat(FF_W2A_OFF), preferred_element_type=f32)
          + jnp.dot(h2, wmat(FF_W2B_OFF), preferred_element_type=f32)
          + srow(R_FF_B2))
    out_ref[...] = layer_norm(x + ff, R_LN3_G, R_LN3_B)


# -------------------- parameters --------------------------------------------
def init_params(key):
    ks = jax.random.split(key, 32)
    i = iter(range(32))

    def w(shape, k):
        return jax.random.normal(ks[k], shape, jnp.float32) * 0.02

    p = {}
    p["emb"] = w((VOCAB, D_MODEL), next(i))
    for pref in ("sa", "ca"):
        p[f"{pref}_wq"] = w((D_MODEL, D_MODEL), next(i))
        p[f"{pref}_bq"] = w((1, D_MODEL), next(i))
        p[f"{pref}_wk"] = w((D_MODEL, D_MODEL), next(i))
        p[f"{pref}_bk"] = w((1, D_MODEL), next(i))
        p[f"{pref}_wv"] = w((D_MODEL, D_MODEL), next(i))
        p[f"{pref}_bv"] = w((1, D_MODEL), next(i))
        p[f"{pref}_wo"] = w((D_MODEL, D_MODEL), next(i))
        p[f"{pref}_bo"] = w((1, D_MODEL), next(i))
    for ln in ("ln1", "ln2", "ln3"):
        p[f"{ln}_g"] = jnp.ones((1, D_MODEL), jnp.float32)
        p[f"{ln}_b"] = jnp.zeros((1, D_MODEL), jnp.float32)
    p["ff_w1"] = w((D_FF, D_MODEL), next(i))
    p["ff_b1"] = w((1, D_FF), next(i))
    p["ff_w2"] = w((D_MODEL, D_FF), next(i))
    p["ff_b2"] = w((1, D_MODEL), next(i))
    return p


def sinusoidal_pe(seq_len, d_model):
    pos = np.arange(seq_len, dtype=np.float32)[:, None]
    div = np.exp(np.arange(0, d_model, 2, dtype=np.float32)
                 * (-math.log(10000.0) / d_model))
    pe = np.zeros((seq_len, d_model), np.float32)
    pe[:, 0::2] = np.sin(pos * div)
    pe[:, 1::2] = np.cos(pos * div)
    return jnp.asarray(pe)                 # (S, D)


# -------------------- host-side packing: ONE weight slab ---------------------
def pack_weights(p):
    pe = jnp.tile(sinusoidal_pe(SEQ, D_MODEL), (BATCH, 1))           # (N, D)
    emb = jnp.pad(p["emb"], ((0, VOCAB_PAD - VOCAB), (0, 0)))        # (56, D)
    w1t, w2t = p["ff_w1"].T, p["ff_w2"].T                            # (32,64), (64,32)
    blocks = [
        emb, pe,
        p["sa_wq"].T, p["sa_wk"].T, p["sa_wv"].T, p["sa_wo"].T,
        p["ca_wq"].T, p["ca_wk"].T, p["ca_wv"].T, p["ca_wo"].T,
        w1t[:, :D_MODEL], w1t[:, D_MODEL:], w2t[:D_MODEL, :], w2t[D_MODEL:, :],
        # small-parameter block (order must match R_* row constants)
        p["sa_bq"], p["sa_bk"], p["sa_bv"], p["sa_bo"],
        p["ca_bq"], p["ca_bk"], p["ca_bv"], p["ca_bo"],
        p["ff_b1"][:, :D_MODEL], p["ff_b1"][:, D_MODEL:], p["ff_b2"],
        p["ln1_g"], p["ln1_b"], p["ln2_g"], p["ln2_b"], p["ln3_g"], p["ln3_b"],
        jnp.zeros((SMALL_ROWS - 17, D_MODEL), jnp.float32),
    ]
    slab = jnp.concatenate(blocks, axis=0).astype(jnp.float32)
    assert slab.shape == (TOTAL_ROWS, D_MODEL)
    return slab


# -------------------- wrapper: pallas_call ------------------------------------
def gpt2_forward(tokens, pad_mask, params):
    # tokens: (S, B) int32 ; pad_mask: (B, S) bool (True = padding position)
    S, B = tokens.shape
    n = B * S
    # batch-major flattening: row i -> (batch i // S, position i % S)
    tok_flat = jnp.transpose(tokens).reshape(n).astype(jnp.int32)
    pad_flat = pad_mask.reshape(n).astype(jnp.int32)
    batch_ids = jnp.repeat(jnp.arange(B, dtype=jnp.int32), S)

    meta = jnp.zeros((n + 8, n), jnp.int32)
    meta = meta.at[0:n, 0].set(tok_flat)       # token ids (column 0)
    meta = meta.at[0:n, 1].set(batch_ids)      # per-row batch ids (column 1)
    meta = meta.at[n, :].set(pad_flat)         # key-padding flags (row n)
    meta = meta.at[n + 1, :].set(batch_ids)    # per-key batch ids (row n+1)

    wslab = pack_weights(params)

    vmem = pl.BlockSpec(memory_space=pltpu.MemorySpace.VMEM)
    out = pl.pallas_call(
        gpt2_decoder_kernel,
        out_shape=jax.ShapeDtypeStruct((n, D_MODEL), jnp.float32),
        in_specs=[vmem, vmem],
        out_specs=vmem,
        compiler_params=pltpu.CompilerParams(vmem_limit_bytes=8 * 1024 * 1024),
        cost_estimate=pl.CostEstimate(flops=720_000, transcendentals=2_304,
                                      bytes_accessed=65_000),
    )(meta, wslab)

    # (B*S, D) -> (S, B, D) to match PyTorch's TransformerDecoderLayer output
    return jnp.transpose(out.reshape(B, S, D_MODEL), (1, 0, 2))


# -------------------- pure-JAX reference (same math, no Pallas) --------------
def _mha_ref(x_q, x_kv, add_mask, wq, bq, wk, bk, wv, bv, wo, bo, nhead):
    S, D = x_q.shape
    hd = D // nhead
    q = x_q @ wq.T + bq
    k = x_kv @ wk.T + bk
    v = x_kv @ wv.T + bv
    scale = 1.0 / math.sqrt(hd)
    outs = []
    for h in range(nhead):
        qh = q[:, h * hd:(h + 1) * hd]
        kh = k[:, h * hd:(h + 1) * hd]
        vh = v[:, h * hd:(h + 1) * hd]
        s = qh @ kh.T * scale + add_mask
        s = s - jnp.max(s, axis=-1, keepdims=True)
        p = jnp.exp(s)
        p = p / jnp.sum(p, axis=-1, keepdims=True)
        outs.append(p @ vh)
    return jnp.concatenate(outs, axis=-1) @ wo.T + bo


def gpt2_reference(tokens, pad_mask, params):
    S, B = tokens.shape
    emb = params["emb"][tokens]
    h = (emb + sinusoidal_pe(S, D_MODEL)[:, None, :]).astype(jnp.float32)
    h_bsd = jnp.transpose(h, (1, 0, 2))

    def one(mem, m_bool):
        m = jnp.where(m_bool, NEG_INF, 0.0).astype(jnp.float32)[None, :]
        x = mem
        sa = _mha_ref(x, x, m, params["sa_wq"], params["sa_bq"], params["sa_wk"],
                      params["sa_bk"], params["sa_wv"], params["sa_bv"],
                      params["sa_wo"], params["sa_bo"], NHEAD)
        x = _layer_norm(x + sa, params["ln1_g"], params["ln1_b"])
        ca = _mha_ref(x, mem, m, params["ca_wq"], params["ca_bq"], params["ca_wk"],
                      params["ca_bk"], params["ca_wv"], params["ca_bv"],
                      params["ca_wo"], params["ca_bo"], NHEAD)
        x = _layer_norm(x + ca, params["ln2_g"], params["ln2_b"])
        ff = jnp.maximum(x @ params["ff_w1"].T + params["ff_b1"], 0.0)
        ff = ff @ params["ff_w2"].T + params["ff_b2"]
        return _layer_norm(x + ff, params["ln3_g"], params["ln3_b"])

    out = jax.vmap(one)(h_bsd, pad_mask)
    return jnp.transpose(out, (1, 0, 2))


# -------------------- main ---------------------------------------------------
if __name__ == "__main__":
    key = jax.random.PRNGKey(0)
    pkey, tkey = jax.random.split(key)
    params = init_params(pkey)

    # tokens: (S, B) int32; padding mask: (B, S) bool, True = padded
    tokens = jax.random.randint(tkey, (SEQ, BATCH), 0, VOCAB, dtype=jnp.int32)
    pad_mask = jnp.array(
        [[False] * SEQ,
         [False] * (SEQ - 2) + [True, True]], dtype=jnp.bool_)

    out = gpt2_forward(tokens, pad_mask, params)
    out = jax.block_until_ready(out)

    ref = gpt2_reference(tokens, pad_mask, params)
    assert out.shape == (SEQ, BATCH, D_MODEL)
    assert bool(jnp.all(jnp.isfinite(out)))
    np.testing.assert_allclose(np.asarray(out), np.asarray(ref),
                               rtol=2e-2, atol=2e-2)

    print("KERNEL_OK")
</pallas_src>

<mosaic_0001>
module attributes {stable_mosaic.version = 11 : i64} {
  func.func @gpt2_decoder_kernel(%arg0: memref<24x16xi32, #tpu.memory_space<vmem>>, %arg1: memref<480x32xf32, #tpu.memory_space<vmem>>, %arg2: memref<16x32xf32, #tpu.memory_space<vmem>>) attributes {dimension_semantics = [], scalar_prefetch = 0 : i64, scratch_operands = 0 : i64, tpu.core_type = #tpu.core_type<tc>} {
    %c0 = arith.constant 0 : index
    %c0_0 = arith.constant 0 : index
    %0 = vector.load %arg0[%c0, %c0_0] : memref<24x16xi32, #tpu.memory_space<vmem>>, vector<16x16xi32>
    %c16 = arith.constant 16 : index
    %c0_1 = arith.constant 0 : index
    %1 = vector.load %arg0[%c16, %c0_1] : memref<24x16xi32, #tpu.memory_space<vmem>>, vector<8x16xi32>
    %2 = vector.extract_strided_slice %0 {offsets = [0, 0], sizes = [16, 1], strides = [1, 1]} : vector<16x16xi32> to vector<16x1xi32>
    %3 = vector.extract_strided_slice %0 {offsets = [0, 1], sizes = [16, 1], strides = [1, 1]} : vector<16x16xi32> to vector<16x1xi32>
    %4 = vector.extract_strided_slice %1 {offsets = [0, 0], sizes = [1, 16], strides = [1, 1]} : vector<8x16xi32> to vector<1x16xi32>
    %5 = vector.extract_strided_slice %1 {offsets = [1, 0], sizes = [1, 16], strides = [1, 1]} : vector<8x16xi32> to vector<1x16xi32>
    %6 = tpu.iota {dimensions = array<i32: 1>} : vector<16x56xi32>
    %7 = vector.broadcast %2 : vector<16x1xi32> to vector<16x56xi32>
    %8 = arith.cmpi eq, %7, %6 : vector<16x56xi32>
    %9 = arith.extui %8 : vector<16x56xi1> to vector<16x56xi32>
    %10 = arith.sitofp %9 : vector<16x56xi32> to vector<16x56xf32>
    %c0_2 = arith.constant 0 : index
    %c0_3 = arith.constant 0 : index
    %11 = vector.load %arg1[%c0_2, %c0_3] : memref<480x32xf32, #tpu.memory_space<vmem>>, vector<56x32xf32>
    %cst = arith.constant dense<0.000000e+00> : vector<16x32xf32>
    %12 = tpu.matmul %10, %11, %cst {dimension_numbers = #tpu.dot_dimension_numbers<[1], [0], [0], [1], [0, 0, 1, 1], [], []>} : vector<16x56xf32>, vector<56x32xf32>, vector<16x32xf32> -> vector<16x32xf32>
    %c56 = arith.constant 56 : index
    %c0_4 = arith.constant 0 : index
    %13 = vector.load %arg1[%c56, %c0_4] : memref<480x32xf32, #tpu.memory_space<vmem>>, vector<16x32xf32>
    %14 = arith.addf %12, %13 : vector<16x32xf32>
    %15 = vector.broadcast %3 : vector<16x1xi32> to vector<16x16xi32>
    %16 = vector.broadcast %5 : vector<1x16xi32> to vector<16x16xi32>
    %17 = arith.cmpi eq, %15, %16 : vector<16x16xi32>
    %c0_i32 = arith.constant 0 : i32
    %18 = vector.broadcast %c0_i32 : i32 to vector<1x16xi32>
    %19 = arith.cmpi eq, %4, %18 : vector<1x16xi32>
    %20 = vector.broadcast %19 : vector<1x16xi1> to vector<16x16xi1>
    %21 = arith.andi %17, %20 : vector<16x16xi1>
    %cst_5 = arith.constant 0.000000e+00 : f32
    %cst_6 = arith.constant -1.000000e+09 : f32
    %22 = vector.broadcast %cst_5 : f32 to vector<16x16xf32>
    %23 = vector.broadcast %cst_6 : f32 to vector<16x16xf32>
    %24 = arith.select %21, %22, %23 : vector<16x16xi1>, vector<16x16xf32>
    %25 = tpu.iota {dimensions = array<i32: 1>} : vector<1x32xi32>
    %c0_i32_7 = arith.constant 0 : i32
    %26 = vector.broadcast %c0_i32_7 : i32 to vector<1x32xi32>
    %27 = arith.cmpi sge, %25, %26 : vector<1x32xi32>
    %c8_i32 = arith.constant 8 : i32
    %28 = vector.broadcast %c8_i32 : i32 to vector<1x32xi32>
    %29 = arith.cmpi slt, %25, %28 : vector<1x32xi32>
    %30 = arith.andi %27, %29 : vector<1x32xi1>
    %31 = arith.extui %30 : vector<1x32xi1> to vector<1x32xi32>
    %32 = arith.sitofp %31 : vector<1x32xi32> to vector<1x32xf32>
    %c8_i32_8 = arith.constant 8 : i32
    %33 = vector.broadcast %c8_i32_8 : i32 to vector<1x32xi32>
    %34 = arith.cmpi sge, %25, %33 : vector<1x32xi32>
    %c16_i32 = arith.constant 16 : i32
    %35 = vector.broadcast %c16_i32 : i32 to vector<1x32xi32>
    %36 = arith.cmpi slt, %25, %35 : vector<1x32xi32>
    %37 = arith.andi %34, %36 : vector<1x32xi1>
    %38 = arith.extui %37 : vector<1x32xi1> to vector<1x32xi32>
    %39 = arith.sitofp %38 : vector<1x32xi32> to vector<1x32xf32>
    %c16_i32_9 = arith.constant 16 : i32
    %40 = vector.broadcast %c16_i32_9 : i32 to vector<1x32xi32>
    %41 = arith.cmpi sge, %25, %40 : vector<1x32xi32>
    %c24_i32 = arith.constant 24 : i32
    %42 = vector.broadcast %c24_i32 : i32 to vector<1x32xi32>
    %43 = arith.cmpi slt, %25, %42 : vector<1x32xi32>
    %44 = arith.andi %41, %43 : vector<1x32xi1>
    %45 = arith.extui %44 : vector<1x32xi1> to vector<1x32xi32>
    %46 = arith.sitofp %45 : vector<1x32xi32> to vector<1x32xf32>
    %c24_i32_10 = arith.constant 24 : i32
    %47 = vector.broadcast %c24_i32_10 : i32 to vector<1x32xi32>
    %48 = arith.cmpi sge, %25, %47 : vector<1x32xi32>
    %c32_i32 = arith.constant 32 : i32
    %49 = vector.broadcast %c32_i32 : i32 to vector<1x32xi32>
    %50 = arith.cmpi slt, %25, %49 : vector<1x32xi32>
    %51 = arith.andi %48, %50 : vector<1x32xi1>
    %52 = arith.extui %51 : vector<1x32xi1> to vector<1x32xi32>
    %53 = arith.sitofp %52 : vector<1x32xi32> to vector<1x32xf32>
    %c456 = arith.constant 456 : index
    %c0_11 = arith.constant 0 : index
    %54 = vector.load %arg1[%c456, %c0_11] : memref<480x32xf32, #tpu.memory_space<vmem>>, vector<24x32xf32>
    %c72 = arith.constant 72 : index
    %c0_12 = arith.constant 0 : index
    %55 = vector.load %arg1[%c72, %c0_12] : memref<480x32xf32, #tpu.memory_space<vmem>>, vector<32x32xf32>
    %cst_13 = arith.constant dense<0.000000e+00> : vector<16x32xf32>
    %56 = tpu.matmul %14, %55, %cst_13 {dimension_numbers = #tpu.dot_dimension_numbers<[1], [0], [0], [1], [0, 0, 1, 1], [], []>} : vector<16x32xf32>, vector<32x32xf32>, vector<16x32xf32> -> vector<16x32xf32>
    %57 = vector.extract_strided_slice %54 {offsets = [0, 0], sizes = [1, 32], strides = [1, 1]} : vector<24x32xf32> to vector<1x32xf32>
    %58 = vector.broadcast %57 : vector<1x32xf32> to vector<16x32xf32>
    %59 = arith.addf %56, %58 : vector<16x32xf32>
    %c104 = arith.constant 104 : index
    %c0_14 = arith.constant 0 : index
    %60 = vector.load %arg1[%c104, %c0_14] : memref<480x32xf32, #tpu.memory_space<vmem>>, vector<32x32xf32>
    %cst_15 = arith.constant dense<0.000000e+00> : vector<16x32xf32>
    %61 = tpu.matmul %14, %60, %cst_15 {dimension_numbers = #tpu.dot_dimension_numbers<[1], [0], [0], [1], [0, 0, 1, 1], [], []>} : vector<16x32xf32>, vector<32x32xf32>, vector<16x32xf32> -> vector<16x32xf32>
    %62 = vector.extract_strided_slice %54 {offsets = [1, 0], sizes = [1, 32], strides = [1, 1]} : vector<24x32xf32> to vector<1x32xf32>
    %63 = vector.broadcast %62 : vector<1x32xf32> to vector<16x32xf32>
    %64 = arith.addf %61, %63 : vector<16x32xf32>
    %c136 = arith.constant 136 : index
    %c0_16 = arith.constant 0 : index
    %65 = vector.load %arg1[%c136, %c0_16] : memref<480x32xf32, #tpu.memory_space<vmem>>, vector<32x32xf32>
    %cst_17 = arith.constant dense<0.000000e+00> : vector<16x32xf32>
    %66 = tpu.matmul %14, %65, %cst_17 {dimension_numbers = #tpu.dot_dimension_numbers<[1], [0], [0], [1], [0, 0, 1, 1], [], []>} : vector<16x32xf32>, vector<32x32xf32>, vector<16x32xf32> -> vector<16x32xf32>
    %67 = vector.extract_strided_slice %54 {offsets = [2, 0], sizes = [1, 32], strides = [1, 1]} : vector<24x32xf32> to vector<1x32xf32>
    %68 = vector.broadcast %67 : vector<1x32xf32> to vector<16x32xf32>
    %69 = arith.addf %66, %68 : vector<16x32xf32>
    %cst_18 = arith.constant 0.000000e+00 : f32
    %70 = vector.broadcast %cst_18 : f32 to vector<16x32xf32>
    %71 = vector.broadcast %32 : vector<1x32xf32> to vector<16x32xf32>
    %72 = arith.mulf %59, %71 : vector<16x32xf32>
    "tpu.trace_start"() <{level = 10 : i32, message = "nd,md->nm"}> : () -> ()
    %cst_19 = arith.constant dense<0.000000e+00> : vector<16x16xf32>
    %73 = tpu.matmul %72, %64, %cst_19 {dimension_numbers = #tpu.dot_dimension_numbers<[1], [1], [0], [0], [0, 0, 1, 0], [], []>} : vector<16x32xf32>, vector<16x32xf32>, vector<16x16xf32> -> vector<16x16xf32>
    "tpu.trace_stop"() : () -> ()
    %cst_20 = arith.constant 0.353553385 : f32
    %74 = vector.broadcast %cst_20 : f32 to vector<16x16xf32>
    %75 = arith.mulf %73, %74 : vector<16x16xf32>
    %76 = arith.addf %75, %24 : vector<16x16xf32>
    %cst_21 = arith.constant dense<0xFF800000> : vector<16xf32>
    %77 = vector.multi_reduction <maximumf>, %76, %cst_21 [1] : vector<16x16xf32> to vector<16xf32>
    %78 = vector.shape_cast %77 : vector<16xf32> to vector<16x1xf32>
    %79 = vector.broadcast %78 : vector<16x1xf32> to vector<16x16xf32>
    %80 = arith.subf %76, %79 : vector<16x16xf32>
    %81 = math.exp %80 : vector<16x16xf32>
    %cst_22 = arith.constant dense<0.000000e+00> : vector<16xf32>
    %82 = vector.multi_reduction <add>, %81, %cst_22 [1] : vector<16x16xf32> to vector<16xf32>
    %83 = vector.shape_cast %82 : vector<16xf32> to vector<16x1xf32>
    %84 = tpu.reciprocal %83 {approx = true} : vector<16x1xf32> -> vector<16x1xf32>
    %85 = vector.broadcast %84 : vector<16x1xf32> to vector<16x16xf32>
    %86 = arith.mulf %81, %85 : vector<16x16xf32>
    %87 = vector.broadcast %32 : vector<1x32xf32> to vector<16x32xf32>
    %88 = arith.mulf %69, %87 : vector<16x32xf32>
    %cst_23 = arith.constant dense<0.000000e+00> : vector<16x32xf32>
    %89 = tpu.matmul %86, %88, %cst_23 {dimension_numbers = #tpu.dot_dimension_numbers<[1], [0], [0], [1], [0, 0, 1, 1], [], []>} : vector<16x16xf32>, vector<16x32xf32>, vector<16x32xf32> -> vector<16x32xf32>
    %90 = arith.addf %70, %89 : vector<16x32xf32>
    %91 = vector.broadcast %39 : vector<1x32xf32> to vector<16x32xf32>
    %92 = arith.mulf %59, %91 : vector<16x32xf32>
    "tpu.trace_start"() <{level = 10 : i32, message = "nd,md->nm"}> : () -> ()
    %cst_24 = arith.constant dense<0.000000e+00> : vector<16x16xf32>
    %93 = tpu.matmul %92, %64, %cst_24 {dimension_numbers = #tpu.dot_dimension_numbers<[1], [1], [0], [0], [0, 0, 1, 0], [], []>} : vector<16x32xf32>, vector<16x32xf32>, vector<16x16xf32> -> vector<16x16xf32>
    "tpu.trace_stop"() : () -> ()
    %cst_25 = arith.constant 0.353553385 : f32
    %94 = vector.broadcast %cst_25 : f32 to vector<16x16xf32>
    %95 = arith.mulf %93, %94 : vector<16x16xf32>
    %96 = arith.addf %95, %24 : vector<16x16xf32>
    %cst_26 = arith.constant dense<0xFF800000> : vector<16xf32>
    %97 = vector.multi_reduction <maximumf>, %96, %cst_26 [1] : vector<16x16xf32> to vector<16xf32>
    %98 = vector.shape_cast %97 : vector<16xf32> to vector<16x1xf32>
    %99 = vector.broadcast %98 : vector<16x1xf32> to vector<16x16xf32>
    %100 = arith.subf %96, %99 : vector<16x16xf32>
    %101 = math.exp %100 : vector<16x16xf32>
    %cst_27 = arith.constant dense<0.000000e+00> : vector<16xf32>
    %102 = vector.multi_reduction <add>, %101, %cst_27 [1] : vector<16x16xf32> to vector<16xf32>
    %103 = vector.shape_cast %102 : vector<16xf32> to vector<16x1xf32>
    %104 = tpu.reciprocal %103 {approx = true} : vector<16x1xf32> -> vector<16x1xf32>
    %105 = vector.broadcast %104 : vector<16x1xf32> to vector<16x16xf32>
    %106 = arith.mulf %101, %105 : vector<16x16xf32>
    %107 = vector.broadcast %39 : vector<1x32xf32> to vector<16x32xf32>
    %108 = arith.mulf %69, %107 : vector<16x32xf32>
    %cst_28 = arith.constant dense<0.000000e+00> : vector<16x32xf32>
    %109 = tpu.matmul %106, %108, %cst_28 {dimension_numbers = #tpu.dot_dimension_numbers<[1], [0], [0], [1], [0, 0, 1, 1], [], []>} : vector<16x16xf32>, vector<16x32xf32>, vector<16x32xf32> -> vector<16x32xf32>
    %110 = arith.addf %90, %109 : vector<16x32xf32>
    %111 = vector.broadcast %46 : vector<1x32xf32> to vector<16x32xf32>
    %112 = arith.mulf %59, %111 : vector<16x32xf32>
    "tpu.trace_start"() <{level = 10 : i32, message = "nd,md->nm"}> : () -> ()
    %cst_29 = arith.constant dense<0.000000e+00> : vector<16x16xf32>
    %113 = tpu.matmul %112, %64, %cst_29 {dimension_numbers = #tpu.dot_dimension_numbers<[1], [1], [0], [0], [0, 0, 1, 0], [], []>} : vector<16x32xf32>, vector<16x32xf32>, vector<16x16xf32> -> vector<16x16xf32>
    "tpu.trace_stop"() : () -> ()
    %cst_30 = arith.constant 0.353553385 : f32
    %114 = vector.broadcast %cst_30 : f32 to vector<16x16xf32>
    %115 = arith.mulf %113, %114 : vector<16x16xf32>
    %116 = arith.addf %115, %24 : vector<16x16xf32>
    %cst_31 = arith.constant dense<0xFF800000> : vector<16xf32>
    %117 = vector.multi_reduction <maximumf>, %116, %cst_31 [1] : vector<16x16xf32> to vector<16xf32>
    %118 = vector.shape_cast %117 : vector<16xf32> to vector<16x1xf32>
    %119 = vector.broadcast %118 : vector<16x1xf32> to vector<16x16xf32>
    %120 = arith.subf %116, %119 : vector<16x16xf32>
    %121 = math.exp %120 : vector<16x16xf32>
    %cst_32 = arith.constant dense<0.000000e+00> : vector<16xf32>
    %122 = vector.multi_reduction <add>, %121, %cst_32 [1] : vector<16x16xf32> to vector<16xf32>
    %123 = vector.shape_cast %122 : vector<16xf32> to vector<16x1xf32>
    %124 = tpu.reciprocal %123 {approx = true} : vector<16x1xf32> -> vector<16x1xf32>
    %125 = vector.broadcast %124 : vector<16x1xf32> to vector<16x16xf32>
    %126 = arith.mulf %121, %125 : vector<16x16xf32>
    %127 = vector.broadcast %46 : vector<1x32xf32> to vector<16x32xf32>
    %128 = arith.mulf %69, %127 : vector<16x32xf32>
    %cst_33 = arith.constant dense<0.000000e+00> : vector<16x32xf32>
    %129 = tpu.matmul %126, %128, %cst_33 {dimension_numbers = #tpu.dot_dimension_numbers<[1], [0], [0], [1], [0, 0, 1, 1], [], []>} : vector<16x16xf32>, vector<16x32xf32>, vector<16x32xf32> -> vector<16x32xf32>
    %130 = arith.addf %110, %129 : vector<16x32xf32>
    %131 = vector.broadcast %53 : vector<1x32xf32> to vector<16x32xf32>
    %132 = arith.mulf %59, %131 : vector<16x32xf32>
    "tpu.trace_start"() <{level = 10 : i32, message = "nd,md->nm"}> : () -> ()
    %cst_34 = arith.constant dense<0.000000e+00> : vector<16x16xf32>
    %133 = tpu.matmul %132, %64, %cst_34 {dimension_numbers = #tpu.dot_dimension_numbers<[1], [1], [0], [0], [0, 0, 1, 0], [], []>} : vector<16x32xf32>, vector<16x32xf32>, vector<16x16xf32> -> vector<16x16xf32>
    "tpu.trace_stop"() : () -> ()
    %cst_35 = arith.constant 0.353553385 : f32
    %134 = vector.broadcast %cst_35 : f32 to vector<16x16xf32>
    %135 = arith.mulf %133, %134 : vector<16x16xf32>
    %136 = arith.addf %135, %24 : vector<16x16xf32>
    %cst_36 = arith.constant dense<0xFF800000> : vector<16xf32>
    %137 = vector.multi_reduction <maximumf>, %136, %cst_36 [1] : vector<16x16xf32> to vector<16xf32>
    %138 = vector.shape_cast %137 : vector<16xf32> to vector<16x1xf32>
    %139 = vector.broadcast %138 : vector<16x1xf32> to vector<16x16xf32>
    %140 = arith.subf %136, %139 : vector<16x16xf32>
    %141 = math.exp %140 : vector<16x16xf32>
    %cst_37 = arith.constant dense<0.000000e+00> : vector<16xf32>
    %142 = vector.multi_reduction <add>, %141, %cst_37 [1] : vector<16x16xf32> to vector<16xf32>
    %143 = vector.shape_cast %142 : vector<16xf32> to vector<16x1xf32>
    %144 = tpu.reciprocal %143 {approx = true} : vector<16x1xf32> -> vector<16x1xf32>
    %145 = vector.broadcast %144 : vector<16x1xf32> to vector<16x16xf32>
    %146 = arith.mulf %141, %145 : vector<16x16xf32>
    %147 = vector.broadcast %53 : vector<1x32xf32> to vector<16x32xf32>
    %148 = arith.mulf %69, %147 : vector<16x32xf32>
    %cst_38 = arith.constant dense<0.000000e+00> : vector<16x32xf32>
    %149 = tpu.matmul %146, %148, %cst_38 {dimension_numbers = #tpu.dot_dimension_numbers<[1], [0], [0], [1], [0, 0, 1, 1], [], []>} : vector<16x16xf32>, vector<16x32xf32>, vector<16x32xf32> -> vector<16x32xf32>
    %150 = arith.addf %130, %149 : vector<16x32xf32>
    %c168 = arith.constant 168 : index
    %c0_39 = arith.constant 0 : index
    %151 = vector.load %arg1[%c168, %c0_39] : memref<480x32xf32, #tpu.memory_space<vmem>>, vector<32x32xf32>
    %cst_40 = arith.constant dense<0.000000e+00> : vector<16x32xf32>
    %152 = tpu.matmul %150, %151, %cst_40 {dimension_numbers = #tpu.dot_dimension_numbers<[1], [0], [0], [1], [0, 0, 1, 1], [], []>} : vector<16x32xf32>, vector<32x32xf32>, vector<16x32xf32> -> vector<16x32xf32>
    %153 = vector.extract_strided_slice %54 {offsets = [3, 0], sizes = [1, 32], strides = [1, 1]} : vector<24x32xf32> to vector<1x32xf32>
    %154 = vector.broadcast %153 : vector<1x32xf32> to vector<16x32xf32>
    %155 = arith.addf %152, %154 : vector<16x32xf32>
    %156 = arith.addf %14, %155 : vector<16x32xf32>
    %cst_41 = arith.constant dense<0.000000e+00> : vector<16xf32>
    %157 = vector.multi_reduction <add>, %156, %cst_41 [1] : vector<16x32xf32> to vector<16xf32>
    %158 = vector.shape_cast %157 : vector<16xf32> to vector<16x1xf32>
    %cst_42 = arith.constant 3.200000e+01 : f32
    %159 = vector.broadcast %cst_42 : f32 to vector<16x1xf32>
    %160 = arith.divf %158, %159 : vector<16x1xf32>
    %161 = vector.broadcast %160 : vector<16x1xf32> to vector<16x32xf32>
    %162 = arith.subf %156, %161 : vector<16x32xf32>
    %163 = arith.mulf %162, %162 : vector<16x32xf32>
    %cst_43 = arith.constant dense<0.000000e+00> : vector<16xf32>
    %164 = vector.multi_reduction <add>, %163, %cst_43 [1] : vector<16x32xf32> to vector<16xf32>
    %165 = vector.shape_cast %164 : vector<16xf32> to vector<16x1xf32>
    %cst_44 = arith.constant 3.200000e+01 : f32
    %166 = vector.broadcast %cst_44 : f32 to vector<16x1xf32>
    %167 = arith.divf %165, %166 : vector<16x1xf32>
    %168 = vector.broadcast %160 : vector<16x1xf32> to vector<16x32xf32>
    %169 = arith.subf %156, %168 : vector<16x32xf32>
    %cst_45 = arith.constant 9.99999974E-6 : f32
    %170 = vector.broadcast %cst_45 : f32 to vector<16x1xf32>
    %171 = arith.addf %167, %170 : vector<16x1xf32>
    %172 = math.rsqrt %171 : vector<16x1xf32>
    %173 = vector.broadcast %172 : vector<16x1xf32> to vector<16x32xf32>
    %174 = arith.mulf %169, %173 : vector<16x32xf32>
    %175 = vector.extract_strided_slice %54 {offsets = [11, 0], sizes = [1, 32], strides = [1, 1]} : vector<24x32xf32> to vector<1x32xf32>
    %176 = vector.broadcast %175 : vector<1x32xf32> to vector<16x32xf32>
    %177 = arith.mulf %174, %176 : vector<16x32xf32>
    %178 = vector.extract_strided_slice %54 {offsets = [12, 0], sizes = [1, 32], strides = [1, 1]} : vector<24x32xf32> to vector<1x32xf32>
    %179 = vector.broadcast %178 : vector<1x32xf32> to vector<16x32xf32>
    %180 = arith.addf %177, %179 : vector<16x32xf32>
    %c200 = arith.constant 200 : index
    %c0_46 = arith.constant 0 : index
    %181 = vector.load %arg1[%c200, %c0_46] : memref<480x32xf32, #tpu.memory_space<vmem>>, vector<32x32xf32>
    %cst_47 = arith.constant dense<0.000000e+00> : vector<16x32xf32>
    %182 = tpu.matmul %180, %181, %cst_47 {dimension_numbers = #tpu.dot_dimension_numbers<[1], [0], [0], [1], [0, 0, 1, 1], [], []>} : vector<16x32xf32>, vector<32x32xf32>, vector<16x32xf32> -> vector<16x32xf32>
    %183 = vector.extract_strided_slice %54 {offsets = [4, 0], sizes = [1, 32], strides = [1, 1]} : vector<24x32xf32> to vector<1x32xf32>
    %184 = vector.broadcast %183 : vector<1x32xf32> to vector<16x32xf32>
    %185 = arith.addf %182, %184 : vector<16x32xf32>
    %c232 = arith.constant 232 : index
    %c0_48 = arith.constant 0 : index
    %186 = vector.load %arg1[%c232, %c0_48] : memref<480x32xf32, #tpu.memory_space<vmem>>, vector<32x32xf32>
    %cst_49 = arith.constant dense<0.000000e+00> : vector<16x32xf32>
    %187 = tpu.matmul %14, %186, %cst_49 {dimension_numbers = #tpu.dot_dimension_numbers<[1], [0], [0], [1], [0, 0, 1, 1], [], []>} : vector<16x32xf32>, vector<32x32xf32>, vector<16x32xf32> -> vector<16x32xf32>
    %188 = vector.extract_strided_slice %54 {offsets = [5, 0], sizes = [1, 32], strides = [1, 1]} : vector<24x32xf32> to vector<1x32xf32>
    %189 = vector.broadcast %188 : vector<1x32xf32> to vector<16x32xf32>
    %190 = arith.addf %187, %189 : vector<16x32xf32>
    %c264 = arith.constant 264 : index
    %c0_50 = arith.constant 0 : index
    %191 = vector.load %arg1[%c264, %c0_50] : memref<480x32xf32, #tpu.memory_space<vmem>>, vector<32x32xf32>
    %cst_51 = arith.constant dense<0.000000e+00> : vector<16x32xf32>
    %192 = tpu.matmul %14, %191, %cst_51 {dimension_numbers = #tpu.dot_dimension_numbers<[1], [0], [0], [1], [0, 0, 1, 1], [], []>} : vector<16x32xf32>, vector<32x32xf32>, vector<16x32xf32> -> vector<16x32xf32>
    %193 = vector.extract_strided_slice %54 {offsets = [6, 0], sizes = [1, 32], strides = [1, 1]} : vector<24x32xf32> to vector<1x32xf32>
    %194 = vector.broadcast %193 : vector<1x32xf32> to vector<16x32xf32>
    %195 = arith.addf %192, %194 : vector<16x32xf32>
    %cst_52 = arith.constant 0.000000e+00 : f32
    %196 = vector.broadcast %cst_52 : f32 to vector<16x32xf32>
    %197 = vector.broadcast %32 : vector<1x32xf32> to vector<16x32xf32>
    %198 = arith.mulf %185, %197 : vector<16x32xf32>
    "tpu.trace_start"() <{level = 10 : i32, message = "nd,md->nm"}> : () -> ()
    %cst_53 = arith.constant dense<0.000000e+00> : vector<16x16xf32>
    %199 = tpu.matmul %198, %190, %cst_53 {dimension_numbers = #tpu.dot_dimension_numbers<[1], [1], [0], [0], [0, 0, 1, 0], [], []>} : vector<16x32xf32>, vector<16x32xf32>, vector<16x16xf32> -> vector<16x16xf32>
    "tpu.trace_stop"() : () -> ()
    %cst_54 = arith.constant 0.353553385 : f32
    %200 = vector.broadcast %cst_54 : f32 to vector<16x16xf32>
    %201 = arith.mulf %199, %200 : vector<16x16xf32>
    %202 = arith.addf %201, %24 : vector<16x16xf32>
    %cst_55 = arith.constant dense<0xFF800000> : vector<16xf32>
    %203 = vector.multi_reduction <maximumf>, %202, %cst_55 [1] : vector<16x16xf32> to vector<16xf32>
    %204 = vector.shape_cast %203 : vector<16xf32> to vector<16x1xf32>
    %205 = vector.broadcast %204 : vector<16x1xf32> to vector<16x16xf32>
    %206 = arith.subf %202, %205 : vector<16x16xf32>
    %207 = math.exp %206 : vector<16x16xf32>
    %cst_56 = arith.constant dense<0.000000e+00> : vector<16xf32>
    %208 = vector.multi_reduction <add>, %207, %cst_56 [1] : vector<16x16xf32> to vector<16xf32>
    %209 = vector.shape_cast %208 : vector<16xf32> to vector<16x1xf32>
    %210 = tpu.reciprocal %209 {approx = true} : vector<16x1xf32> -> vector<16x1xf32>
    %211 = vector.broadcast %210 : vector<16x1xf32> to vector<16x16xf32>
    %212 = arith.mulf %207, %211 : vector<16x16xf32>
    %213 = vector.broadcast %32 : vector<1x32xf32> to vector<16x32xf32>
    %214 = arith.mulf %195, %213 : vector<16x32xf32>
    %cst_57 = arith.constant dense<0.000000e+00> : vector<16x32xf32>
    %215 = tpu.matmul %212, %214, %cst_57 {dimension_numbers = #tpu.dot_dimension_numbers<[1], [0], [0], [1], [0, 0, 1, 1], [], []>} : vector<16x16xf32>, vector<16x32xf32>, vector<16x32xf32> -> vector<16x32xf32>
    %216 = arith.addf %196, %215 : vector<16x32xf32>
    %217 = vector.broadcast %39 : vector<1x32xf32> to vector<16x32xf32>
    %218 = arith.mulf %185, %217 : vector<16x32xf32>
    "tpu.trace_start"() <{level = 10 : i32, message = "nd,md->nm"}> : () -> ()
    %cst_58 = arith.constant dense<0.000000e+00> : vector<16x16xf32>
    %219 = tpu.matmul %218, %190, %cst_58 {dimension_numbers = #tpu.dot_dimension_numbers<[1], [1], [0], [0], [0, 0, 1, 0], [], []>} : vector<16x32xf32>, vector<16x32xf32>, vector<16x16xf32> -> vector<16x16xf32>
    "tpu.trace_stop"() : () -> ()
    %cst_59 = arith.constant 0.353553385 : f32
    %220 = vector.broadcast %cst_59 : f32 to vector<16x16xf32>
    %221 = arith.mulf %219, %220 : vector<16x16xf32>
    %222 = arith.addf %221, %24 : vector<16x16xf32>
    %cst_60 = arith.constant dense<0xFF800000> : vector<16xf32>
    %223 = vector.multi_reduction <maximumf>, %222, %cst_60 [1] : vector<16x16xf32> to vector<16xf32>
    %224 = vector.shape_cast %223 : vector<16xf32> to vector<16x1xf32>
    %225 = vector.broadcast %224 : vector<16x1xf32> to vector<16x16xf32>
    %226 = arith.subf %222, %225 : vector<16x16xf32>
    %227 = math.exp %226 : vector<16x16xf32>
    %cst_61 = arith.constant dense<0.000000e+00> : vector<16xf32>
    %228 = vector.multi_reduction <add>, %227, %cst_61 [1] : vector<16x16xf32> to vector<16xf32>
    %229 = vector.shape_cast %228 : vector<16xf32> to vector<16x1xf32>
    %230 = tpu.reciprocal %229 {approx = true} : vector<16x1xf32> -> vector<16x1xf32>
    %231 = vector.broadcast %230 : vector<16x1xf32> to vector<16x16xf32>
    %232 = arith.mulf %227, %231 : vector<16x16xf32>
    %233 = vector.broadcast %39 : vector<1x32xf32> to vector<16x32xf32>
    %234 = arith.mulf %195, %233 : vector<16x32xf32>
    %cst_62 = arith.constant dense<0.000000e+00> : vector<16x32xf32>
    %235 = tpu.matmul %232, %234, %cst_62 {dimension_numbers = #tpu.dot_dimension_numbers<[1], [0], [0], [1], [0, 0, 1, 1], [], []>} : vector<16x16xf32>, vector<16x32xf32>, vector<16x32xf32> -> vector<16x32xf32>
    %236 = arith.addf %216, %235 : vector<16x32xf32>
    %237 = vector.broadcast %46 : vector<1x32xf32> to vector<16x32xf32>
    %238 = arith.mulf %185, %237 : vector<16x32xf32>
    "tpu.trace_start"() <{level = 10 : i32, message = "nd,md->nm"}> : () -> ()
    %cst_63 = arith.constant dense<0.000000e+00> : vector<16x16xf32>
    %239 = tpu.matmul %238, %190, %cst_63 {dimension_numbers = #tpu.dot_dimension_numbers<[1], [1], [0], [0], [0, 0, 1, 0], [], []>} : vector<16x32xf32>, vector<16x32xf32>, vector<16x16xf32> -> vector<16x16xf32>
    "tpu.trace_stop"() : () -> ()
    %cst_64 = arith.constant 0.353553385 : f32
    %240 = vector.broadcast %cst_64 : f32 to vector<16x16xf32>
    %241 = arith.mulf %239, %240 : vector<16x16xf32>
    %242 = arith.addf %241, %24 : vector<16x16xf32>
    %cst_65 = arith.constant dense<0xFF800000> : vector<16xf32>
    %243 = vector.multi_reduction <maximumf>, %242, %cst_65 [1] : vector<16x16xf32> to vector<16xf32>
    %244 = vector.shape_cast %243 : vector<16xf32> to vector<16x1xf32>
    %245 = vector.broadcast %244 : vector<16x1xf32> to vector<16x16xf32>
    %246 = arith.subf %242, %245 : vector<16x16xf32>
    %247 = math.exp %246 : vector<16x16xf32>
    %cst_66 = arith.constant dense<0.000000e+00> : vector<16xf32>
    %248 = vector.multi_reduction <add>, %247, %cst_66 [1] : vector<16x16xf32> to vector<16xf32>
    %249 = vector.shape_cast %248 : vector<16xf32> to vector<16x1xf32>
    %250 = tpu.reciprocal %249 {approx = true} : vector<16x1xf32> -> vector<16x1xf32>
    %251 = vector.broadcast %250 : vector<16x1xf32> to vector<16x16xf32>
    %252 = arith.mulf %247, %251 : vector<16x16xf32>
    %253 = vector.broadcast %46 : vector<1x32xf32> to vector<16x32xf32>
    %254 = arith.mulf %195, %253 : vector<16x32xf32>
    %cst_67 = arith.constant dense<0.000000e+00> : vector<16x32xf32>
    %255 = tpu.matmul %252, %254, %cst_67 {dimension_numbers = #tpu.dot_dimension_numbers<[1], [0], [0], [1], [0, 0, 1, 1], [], []>} : vector<16x16xf32>, vector<16x32xf32>, vector<16x32xf32> -> vector<16x32xf32>
    %256 = arith.addf %236, %255 : vector<16x32xf32>
    %257 = vector.broadcast %53 : vector<1x32xf32> to vector<16x32xf32>
    %258 = arith.mulf %185, %257 : vector<16x32xf32>
    "tpu.trace_start"() <{level = 10 : i32, message = "nd,md->nm"}> : () -> ()
    %cst_68 = arith.constant dense<0.000000e+00> : vector<16x16xf32>
    %259 = tpu.matmul %258, %190, %cst_68 {dimension_numbers = #tpu.dot_dimension_numbers<[1], [1], [0], [0], [0, 0, 1, 0], [], []>} : vector<16x32xf32>, vector<16x32xf32>, vector<16x16xf32> -> vector<16x16xf32>
    "tpu.trace_stop"() : () -> ()
    %cst_69 = arith.constant 0.353553385 : f32
    %260 = vector.broadcast %cst_69 : f32 to vector<16x16xf32>
    %261 = arith.mulf %259, %260 : vector<16x16xf32>
    %262 = arith.addf %261, %24 : vector<16x16xf32>
    %cst_70 = arith.constant dense<0xFF800000> : vector<16xf32>
    %263 = vector.multi_reduction <maximumf>, %262, %cst_70 [1] : vector<16x16xf32> to vector<16xf32>
    %264 = vector.shape_cast %263 : vector<16xf32> to vector<16x1xf32>
    %265 = vector.broadcast %264 : vector<16x1xf32> to vector<16x16xf32>
    %266 = arith.subf %262, %265 : vector<16x16xf32>
    %267 = math.exp %266 : vector<16x16xf32>
    %cst_71 = arith.constant dense<0.000000e+00> : vector<16xf32>
    %268 = vector.multi_reduction <add>, %267, %cst_71 [1] : vector<16x16xf32> to vector<16xf32>
    %269 = vector.shape_cast %268 : vector<16xf32> to vector<16x1xf32>
    %270 = tpu.reciprocal %269 {approx = true} : vector<16x1xf32> -> vector<16x1xf32>
    %271 = vector.broadcast %270 : vector<16x1xf32> to vector<16x16xf32>
    %272 = arith.mulf %267, %271 : vector<16x16xf32>
    %273 = vector.broadcast %53 : vector<1x32xf32> to vector<16x32xf32>
    %274 = arith.mulf %195, %273 : vector<16x32xf32>
    %cst_72 = arith.constant dense<0.000000e+00> : vector<16x32xf32>
    %275 = tpu.matmul %272, %274, %cst_72 {dimension_numbers = #tpu.dot_dimension_numbers<[1], [0], [0], [1], [0, 0, 1, 1], [], []>} : vector<16x16xf32>, vector<16x32xf32>, vector<16x32xf32> -> vector<16x32xf32>
    %276 = arith.addf %256, %275 : vector<16x32xf32>
    %c296 = arith.constant 296 : index
    %c0_73 = arith.constant 0 : index
    %277 = vector.load %arg1[%c296, %c0_73] : memref<480x32xf32, #tpu.memory_space<vmem>>, vector<32x32xf32>
    %cst_74 = arith.constant dense<0.000000e+00> : vector<16x32xf32>
    %278 = tpu.matmul %276, %277, %cst_74 {dimension_numbers = #tpu.dot_dimension_numbers<[1], [0], [0], [1], [0, 0, 1, 1], [], []>} : vector<16x32xf32>, vector<32x32xf32>, vector<16x32xf32> -> vector<16x32xf32>
    %279 = vector.extract_strided_slice %54 {offsets = [7, 0], sizes = [1, 32], strides = [1, 1]} : vector<24x32xf32> to vector<1x32xf32>
    %280 = vector.broadcast %279 : vector<1x32xf32> to vector<16x32xf32>
    %281 = arith.addf %278, %280 : vector<16x32xf32>
    %282 = arith.addf %180, %281 : vector<16x32xf32>
    %cst_75 = arith.constant dense<0.000000e+00> : vector<16xf32>
    %283 = vector.multi_reduction <add>, %282, %cst_75 [1] : vector<16x32xf32> to vector<16xf32>
    %284 = vector.shape_cast %283 : vector<16xf32> to vector<16x1xf32>
    %cst_76 = arith.constant 3.200000e+01 : f32
    %285 = vector.broadcast %cst_76 : f32 to vector<16x1xf32>
    %286 = arith.divf %284, %285 : vector<16x1xf32>
    %287 = vector.broadcast %286 : vector<16x1xf32> to vector<16x32xf32>
    %288 = arith.subf %282, %287 : vector<16x32xf32>
    %289 = arith.mulf %288, %288 : vector<16x32xf32>
    %cst_77 = arith.constant dense<0.000000e+00> : vector<16xf32>
    %290 = vector.multi_reduction <add>, %289, %cst_77 [1] : vector<16x32xf32> to vector<16xf32>
    %291 = vector.shape_cast %290 : vector<16xf32> to vector<16x1xf32>
    %cst_78 = arith.constant 3.200000e+01 : f32
    %292 = vector.broadcast %cst_78 : f32 to vector<16x1xf32>
    %293 = arith.divf %291, %292 : vector<16x1xf32>
    %294 = vector.broadcast %286 : vector<16x1xf32> to vector<16x32xf32>
    %295 = arith.subf %282, %294 : vector<16x32xf32>
    %cst_79 = arith.constant 9.99999974E-6 : f32
    %296 = vector.broadcast %cst_79 : f32 to vector<16x1xf32>
    %297 = arith.addf %293, %296 : vector<16x1xf32>
    %298 = math.rsqrt %297 : vector<16x1xf32>
    %299 = vector.broadcast %298 : vector<16x1xf32> to vector<16x32xf32>
    %300 = arith.mulf %295, %299 : vector<16x32xf32>
    %301 = vector.extract_strided_slice %54 {offsets = [13, 0], sizes = [1, 32], strides = [1, 1]} : vector<24x32xf32> to vector<1x32xf32>
    %302 = vector.broadcast %301 : vector<1x32xf32> to vector<16x32xf32>
    %303 = arith.mulf %300, %302 : vector<16x32xf32>
    %304 = vector.extract_strided_slice %54 {offsets = [14, 0], sizes = [1, 32], strides = [1, 1]} : vector<24x32xf32> to vector<1x32xf32>
    %305 = vector.broadcast %304 : vector<1x32xf32> to vector<16x32xf32>
    %306 = arith.addf %303, %305 : vector<16x32xf32>
    %c328 = arith.constant 328 : index
    %c0_80 = arith.constant 0 : index
    %307 = vector.load %arg1[%c328, %c0_80] : memref<480x32xf32, #tpu.memory_space<vmem>>, vector<32x32xf32>
    %cst_81 = arith.constant dense<0.000000e+00> : vector<16x32xf32>
    %308 = tpu.matmul %306, %307, %cst_81 {dimension_numbers = #tpu.dot_dimension_numbers<[1], [0], [0], [1], [0, 0, 1, 1], [], []>} : vector<16x32xf32>, vector<32x32xf32>, vector<16x32xf32> -> vector<16x32xf32>
    %309 = vector.extract_strided_slice %54 {offsets = [8, 0], sizes = [1, 32], strides = [1, 1]} : vector<24x32xf32> to vector<1x32xf32>
    %310 = vector.broadcast %309 : vector<1x32xf32> to vector<16x32xf32>
    %311 = arith.addf %308, %310 : vector<16x32xf32>
    %cst_82 = arith.constant 0.000000e+00 : f32
    %312 = vector.broadcast %cst_82 : f32 to vector<16x32xf32>
    %313 = arith.maximumf %311, %312 : vector<16x32xf32>
    %c360 = arith.constant 360 : index
    %c0_83 = arith.constant 0 : index
    %314 = vector.load %arg1[%c360, %c0_83] : memref<480x32xf32, #tpu.memory_space<vmem>>, vector<32x32xf32>
    %cst_84 = arith.constant dense<0.000000e+00> : vector<16x32xf32>
    %315 = tpu.matmul %306, %314, %cst_84 {dimension_numbers = #tpu.dot_dimension_numbers<[1], [0], [0], [1], [0, 0, 1, 1], [], []>} : vector<16x32xf32>, vector<32x32xf32>, vector<16x32xf32> -> vector<16x32xf32>
    %316 = vector.extract_strided_slice %54 {offsets = [9, 0], sizes = [1, 32], strides = [1, 1]} : vector<24x32xf32> to vector<1x32xf32>
    %317 = vector.broadcast %316 : vector<1x32xf32> to vector<16x32xf32>
    %318 = arith.addf %315, %317 : vector<16x32xf32>
    %cst_85 = arith.constant 0.000000e+00 : f32
    %319 = vector.broadcast %cst_85 : f32 to vector<16x32xf32>
    %320 = arith.maximumf %318, %319 : vector<16x32xf32>
    %c392 = arith.constant 392 : index
    %c0_86 = arith.constant 0 : index
    %321 = vector.load %arg1[%c392, %c0_86] : memref<480x32xf32, #tpu.memory_space<vmem>>, vector<32x32xf32>
    %cst_87 = arith.constant dense<0.000000e+00> : vector<16x32xf32>
    %322 = tpu.matmul %313, %321, %cst_87 {dimension_numbers = #tpu.dot_dimension_numbers<[1], [0], [0], [1], [0, 0, 1, 1], [], []>} : vector<16x32xf32>, vector<32x32xf32>, vector<16x32xf32> -> vector<16x32xf32>
    %c424 = arith.constant 424 : index
    %c0_88 = arith.constant 0 : index
    %323 = vector.load %arg1[%c424, %c0_88] : memref<480x32xf32, #tpu.memory_space<vmem>>, vector<32x32xf32>
    %cst_89 = arith.constant dense<0.000000e+00> : vector<16x32xf32>
    %324 = tpu.matmul %320, %323, %cst_89 {dimension_numbers = #tpu.dot_dimension_numbers<[1], [0], [0], [1], [0, 0, 1, 1], [], []>} : vector<16x32xf32>, vector<32x32xf32>, vector<16x32xf32> -> vector<16x32xf32>
    %325 = arith.addf %322, %324 : vector<16x32xf32>
    %326 = vector.extract_strided_slice %54 {offsets = [10, 0], sizes = [1, 32], strides = [1, 1]} : vector<24x32xf32> to vector<1x32xf32>
    %327 = vector.broadcast %326 : vector<1x32xf32> to vector<16x32xf32>
    %328 = arith.addf %325, %327 : vector<16x32xf32>
    %329 = arith.addf %306, %328 : vector<16x32xf32>
    %cst_90 = arith.constant dense<0.000000e+00> : vector<16xf32>
    %330 = vector.multi_reduction <add>, %329, %cst_90 [1] : vector<16x32xf32> to vector<16xf32>
    %331 = vector.shape_cast %330 : vector<16xf32> to vector<16x1xf32>
    %cst_91 = arith.constant 3.200000e+01 : f32
    %332 = vector.broadcast %cst_91 : f32 to vector<16x1xf32>
    %333 = arith.divf %331, %332 : vector<16x1xf32>
    %334 = vector.broadcast %333 : vector<16x1xf32> to vector<16x32xf32>
    %335 = arith.subf %329, %334 : vector<16x32xf32>
    %336 = arith.mulf %335, %335 : vector<16x32xf32>
    %cst_92 = arith.constant dense<0.000000e+00> : vector<16xf32>
    %337 = vector.multi_reduction <add>, %336, %cst_92 [1] : vector<16x32xf32> to vector<16xf32>
    %338 = vector.shape_cast %337 : vector<16xf32> to vector<16x1xf32>
    %cst_93 = arith.constant 3.200000e+01 : f32
    %339 = vector.broadcast %cst_93 : f32 to vector<16x1xf32>
    %340 = arith.divf %338, %339 : vector<16x1xf32>
    %341 = vector.broadcast %333 : vector<16x1xf32> to vector<16x32xf32>
    %342 = arith.subf %329, %341 : vector<16x32xf32>
    %cst_94 = arith.constant 9.99999974E-6 : f32
    %343 = vector.broadcast %cst_94 : f32 to vector<16x1xf32>
    %344 = arith.addf %340, %343 : vector<16x1xf32>
    %345 = math.rsqrt %344 : vector<16x1xf32>
    %346 = vector.broadcast %345 : vector<16x1xf32> to vector<16x32xf32>
    %347 = arith.mulf %342, %346 : vector<16x32xf32>
    %348 = vector.extract_strided_slice %54 {offsets = [15, 0], sizes = [1, 32], strides = [1, 1]} : vector<24x32xf32> to vector<1x32xf32>
    %349 = vector.broadcast %348 : vector<1x32xf32> to vector<16x32xf32>
    %350 = arith.mulf %347, %349 : vector<16x32xf32>
    %351 = vector.extract_strided_slice %54 {offsets = [16, 0], sizes = [1, 32], strides = [1, 1]} : vector<24x32xf32> to vector<1x32xf32>
    %352 = vector.broadcast %351 : vector<1x32xf32> to vector<16x32xf32>
    %353 = arith.addf %350, %352 : vector<16x32xf32>
    %c0_95 = arith.constant 0 : index
    %c0_96 = arith.constant 0 : index
    %354 = vector.load %arg2[%c0_95, %c0_96] : memref<16x32xf32, #tpu.memory_space<vmem>>, vector<16x32xf32>
    tpu.vector_store %arg2[%c0_95, %c0_96], %353 {strides = array<i32>} : memref<16x32xf32, #tpu.memory_space<vmem>>, vector<16x32xf32>,
    return
  }
}

</mosaic_0001>

<bundles_post_ra>
// kernel: tpu_custom_call.1
= control target key start
LH: loop header
LB: loop body
LE: loop exit
PB: predicated region body
PF: predicated region fallthrough
CT: control target
= control target key end

     0   :  { %v3702_v1 = vmov 0   ;;  %s4303_s0 = inlined_call_operand.vmem [shape: s32[24,16], index: 0, kind: input, shape index: {}]   ;;  %s4304_s1 = inlined_call_operand.vmem [shape: f32[480,32], index: 1, kind: input, shape index: {}]   ;;  %s4305_s2 = inlined_call_operand.hbm [shape: f32[16,32], index: 2, kind: output, shape index: {}]  }
   0x1   :  { %v3727_v0 = vld [vmem:[%s4303_s0] sm:$0xff]  ;;  %3598 = vset.pattern.permute.xlu0 %v3702_v1  ;;  %v30_v3 = vld [vmem:[%s4304_s1 + $0x8] sm:$0xff]  ;;  %v31_v4 = vld [vmem:[%s4304_s1 + $0x10] sm:$0xff] }
   0x2   :  { %v29_v2 = vld [vmem:[%s4304_s1] sm:$0xff]  ;;  %18 = vperm.xlu0 %3598, %v3727_v0   ;;  %v3743_v5 = vld [vmem:[%s4303_s0 + $0x8] sm:$0xff]  ;;  %v32_v7 = vld [vmem:[%s4304_s1 + $0x18] sm:$0xff] }
   0x3   :  { %v3389_v6 = vpack.c.bf16 %v30_v3, %v29_v2  ;;  %v3393_v8 = vpack.c.bf16 %v32_v7, %v31_v4  ;;  %v33_v9 = vld [vmem:[%s4304_s1 + $0x20] sm:$0xff]  ;;  %v34_v10 = vld [vmem:[%s4304_s1 + $0x28] sm:$0xff] }
   0x4   :  { %7 = vsyncpa [#allocation3], 0  ;;  %v3397_v11 = vpack.c.bf16 %v34_v10, %v33_v9  ;;  %v166_v12 = vld [vmem:[%s4304_s1 + $0x48] sm:$0xff]  ;;  %v167_v13 = vld [vmem:[%s4304_s1 + $0x50] sm:$0xff]  ;;  %v15_v16 = vlaneseq  ;;  %vm38_vm0 = vcmask 457728   ;;  %v3703_v19 = vmov 0.0  }
   0x5   :  { %3390 = vmatprep.subr.bf16.mxu0 %v3389_v6  ;;  %v3401_v14 = vpack.c.bf16 %v167_v13, %v166_v12  ;;  %v35_v15 = vld [vmem:[%s4304_s1 + $0x30] sm:$0xff]  ;;  %v168_v23 = vld [vmem:[%s4304_s1 + $0x58] sm:$0xff]  ;;  %v169_v24 = vld [vmem:[%s4304_s1 + $0x60] sm:$0xff]  ;;  %vm174_vm3 = vcmask 261120   ;;  %v3704_v44 = vmov 1   ;;  %s3706_s22 = smov [#allocation2]  }
   0x6   :  { %3392 = vmatpush3.bf16.msra.mxu0 %v3389_v6  ;;  %21 = vperm.xlu0 %3598, %v3743_v5   ;;  %v3764_v17 = vand.u32 127, %v15_v16  ;;  %v3405_v25 = vpack.c.bf16 %v169_v24, %v168_v23  ;;  %v256_v26 = vld [vmem:[%s4304_s1 + $0x68] sm:$0xff]  ;;  %v257_v27 = vld [vmem:[%s4304_s1 + $0x70] sm:$0xff]  ;;  %v36_v29 = vld [vmem:[%s4304_s1 + $0x38] sm:$0xff]  ;;  %v3824_v45 = vshrl.u32 %v15_v16, 7  ;;  %s2892_s23 = sshll.u32 %s3706_s22, 4  ;;  %s2893_s23 = int_to_ptr.vmem [resolvable:$true] %s2892_s23 }
   0x7   :  { %3394 = vmatprep.subr.bf16.mxu0 %v3393_v8  ;;  %3402 = vmatprep.subr.bf16.mxu1 %v3401_v14  ;;  %v3409_v28 = vpack.c.bf16 %v257_v27, %v256_v26  ;;  %v37_v30 = vld [vmem:[%s4304_s1 + $0x40] sm:$0xff]  ;;  %v258_v32 = vld [vmem:[%s4304_s1 + $0x78] sm:$0xff]  ;;  %v339_v38 = vld [vmem:[%s4304_s1 + $0x88] sm:$0xff]  ;;  %p3683_p1 = scmp.lt.s32.totalorder %s2893_s23, %s2893_s23 }
   0x8   :  { %3404 = vmatpush3.bf16.msra.mxu1 %v3401_v14  ;;  %v259_v33 = vld [vmem:[%s4304_s1 + $0x80] sm:$0xff]  ;;  %v340_v39 = vld [vmem:[%s4304_s1 + $0x90] sm:$0xff]  ;;  %v341_v41 = vld [vmem:[%s4304_s1 + $0x98] sm:$0xff]  ;;  %3599 = vset.pattern.permute.xlu1 %v3704_v44  ;;  %v3827_v46 = vsub.s32 0, %v3824_v45  ;;  %vm148_vm4 = vcmp.ge.s32.totalorder %v3764_v17, 8  ;;  %vm149_vm5 = vcmp.lt.s32.totalorder %v3764_v17, 16 }
   0x9   :  { %3406 = vmatprep.subr.bf16.mxu1 %v3405_v25  ;;  %v3413_v37 = vpack.c.bf16 %v259_v33, %v258_v32  ;;  %v3417_v40 = vpack.c.bf16 %v340_v39, %v339_v38  ;;  %v342_v42 = vld [vmem:[%s4304_s1 + $0xa0] sm:$0xff]  ;;  %121 = vperm.xlu1 %3599, %v3727_v0   ;;  %v3834_v47 = vld [vmem:[%s4304_s1 + $0x1c8] sm:$0xff]  ;;  %vm144_vm6 = vcmp.lt.s32.totalorder %v3764_v17, 8  ;;  %vm150_vm7 = vmand %vm148_vm4, %vm149_vm5  ;;  %v3846_v53 = vsub.s32 1, %v3824_v45 }
   0xa   :  { %3396 = vmatpush3.bf16.msra.mxu0 %v3393_v8  ;;  %v3421_v43 = vpack.c.bf16 %v342_v42, %v341_v41  ;;  %3600 = vset.pattern.permute.xlu0 %v3704_v44  ;;  %v173_v48 = vrot.slane %v3834_v47, %v3827_v46  ;;  %v3840_v50 = vsel %vm144_vm6, 1.0, %v3703_v19  ;;  %v3843_v51 = vsel %vm150_vm7, 1.0, %v3703_v19  ;;  %vm3863_vm10 = vmpackc.low %vm174_vm3, %vm174_vm3  ;;  %v14_v26 = vld [vmem:[%s4303_s0 + $0x10] sm:$0xff] }
   0xb   :  { %3398 = vmatprep.subr.bf16.mxu0 %v3397_v11  ;;  %v263_v57 = vrot.slane %v3834_v47, %v3846_v53  ;;  %v345_v61 = vsub.s32 2, %v3824_v45  ;;  %vm153_vm8 = vcmp.ge.s32.totalorder %v3764_v17, 16  ;;  %vm154_vm9 = vcmp.lt.s32.totalorder %v3764_v17, 24 }
   0xc   :  { %3408 = vmatpush3.bf16.msra.mxu1 %v3405_v25  ;;  %vm158_vm11 = vcmp.ge.s32.totalorder %v3764_v17, 24  ;;  %vm159_vm12 = vcmp.lt.s32.totalorder %v3764_v17, 32  ;;  %vm155_vm13 = vmand %vm153_vm8, %vm154_vm9  ;;  %vm132_vm15 = vcmp.eq.s32.totalorder %v14_v26, 0  ;;  %v3705_v39 = vmov -1e+09  }
   0xd   :  { %3410 = vmatprep.subr.bf16.mxu1 %v3409_v28  ;;  %124 = vperm.xlu1 %3599, %v3743_v5   ;;  %v346_v2 = vrot.slane %v3834_v47, %v345_v61  ;;  %vm160_vm14 = vmand %vm158_vm11, %vm159_vm12  ;;  %v3892_v5 = vsel %vm155_vm13, 1.0, %v3703_v19  ;;  %vm515_vm6 = vcmask 130048  }
   0xe   :  { %3400 = vmatpush3.bf16.msra.mxu0 %v3397_v11  ;;  %v3895_v8 = vsel %vm160_vm14, 1.0, %v3703_v19 }
   0xf   :  { %3140 = vmatprep.subr.mxu0 %v35_v15 }
  0x12   :  { %3141 = vmatpush3.msra.mxu0 %v35_v15 }
  0x81   :  { %v19_v18 = vpop.permute.xlu0 %18 }
  0x82   :  { %vm23_vm1 = vcmp.eq.s32.totalorder %v19_v18, %v3764_v17 }
  0x83   :  { %v2903_v20 = vsel %vm23_vm1, 1.0, %v3703_v19 }
  0x84   :  { %3142 = vmatprep.mubr.msk.f32.mxu0 %vm38_vm0, %v2903_v20 }
  0x85   :  { %v22_v21 = vpop.permute.xlu0 %21 }
  0x86   :  { %vm24_vm2 = vcmp.eq.s32.totalorder %v22_v21, %v3764_v17 }
  0x87   :  { %v2904_v22 = vsel %vm24_vm2, 1.0, %v3703_v19 }
  0x88   :  { %3143 = vmatmul.mubr.msk.f32.vlgmr.msra.gmra.mrb[0].mxu0 %vm38_vm0, %v2904_v22  ;;  %v122_v27 = vpop.permute.xlu1 %121 }
 0x15b   :  { %v3144_v31 = vpop.f32.mrb[0].mxu0 }
 0x15c   :  { %v111_v34 = vpop.f32.mrb[1].mxu0  ;;  %v3796_v36 = vadd.f32 %v3144_v31, %v37_v30  ;;  %v129_v30 = vrot.slane %v14_v26, %v3846_v53  ;;  %v125_v31 = vpop.permute.xlu1 %124 }
 0x15d   :  { %v3794_v35 = vadd.f32 %v111_v34, %v36_v29 }
 0x15e   :  { %vm131_vm1 = vcmp.eq.s32.totalorder %v125_v31, %v129_v30  ;;  %vm130_vm2 = vcmp.eq.s32.totalorder %v122_v27, %v129_v30 }
 0x15f   :  { %3153 = vmatprep.mubr.msk.f32.mxu1 %vm174_vm3, %v3794_v35 }
 0x160   :  { %3154 = vmatmul.mubr.msk.f32.vlgmr.msra.gmra.mrb[0].mxu1 %vm174_vm3, %v3796_v36 }
 0x161   :  { %3412 = vmatpush3.bf16.msra.mxu1 %v3409_v28  ;;  %3164 = vmatprep.mubr.msk.f32.mxu1 %vm174_vm3, %v3794_v35  ;;  %v133_v28 = vsel %vm132_vm15, 1, %v3702_v1 }
 0x162   :  { %3414 = vmatprep.subr.bf16.mxu1 %v3413_v37  ;;  %v137_v29 = vrot.slane %v133_v28, %v3827_v46 }
 0x164   :  { %vm138_vm0 = vcmp.eq.s32.totalorder %v137_v29, 1 }
 0x165   :  { %3416 = vmatpush3.bf16.msra.mxu1 %v3413_v37  ;;  %vm140_vm4 = vmand %vm131_vm1, %vm138_vm0 }
 0x166   :  { %3418 = vmatprep.subr.bf16.mxu1 %v3417_v40  ;;  %vm139_vm5 = vmand %vm130_vm2, %vm138_vm0 }
 0x167   :  { %v3935_v42 = vsel %vm139_vm5, 0.0, %v3705_v39 }
 0x168   :  { %3165 = vmatmul.mubr.msk.f32.vlgmr.msra.gmra.mrb[2].mxu1 %vm174_vm3, %v3796_v36 }
 0x169   :  { %3420 = vmatpush3.bf16.msra.mxu1 %v3417_v40  ;;  %3175 = vmatprep.mubr.msk.f32.mxu1 %vm174_vm3, %v3794_v35  ;;  %v3933_v40 = vsel %vm140_vm4, 0.0, %v3705_v39 }
 0x16a   :  { %3422 = vmatprep.subr.bf16.mxu1 %v3421_v43 }
 0x16d   :  { %3424 = vmatpush3.bf16.msra.mxu1 %v3421_v43 }
 0x170   :  { %3176 = vmatmul.mubr.msk.f32.vlgmr.msra.gmra.mrb[4].mxu1 %vm174_vm3, %v3796_v36 }
 0x233   :  { %v3155_v49 = vpop.f32.mrb[0].mxu1 }
 0x234   :  { %v247_v52 = vpop.f32.mrb[1].mxu1  ;;  %v3874_v3 = vadd.f32 %v3155_v49, %v173_v48 }
 0x235   :  { %v3848_v54 = vadd.f32 %v247_v52, %v173_v48 }
 0x236   :  { %v423_v9 = vmul.f32 %v3840_v50, %v3874_v3  ;;  %v541_v10 = vmul.f32 %v3843_v51, %v3874_v3  ;;  %v814_v25 = vmul.f32 %v3892_v5, %v3874_v3 }
 0x237   :  { %v422_v55 = vmul.f32 %v3840_v50, %v3848_v54  ;;  %v540_v56 = vmul.f32 %v3843_v51, %v3848_v54  ;;  %v813_v20 = vmul.f32 %v3892_v5, %v3848_v54 }
 0x239   :  { %3182 = vmatprep.mubr.msk.f32.mxu1 %vm174_vm3, %v422_v55  ;;  %3189 = vmatprep.mubr.msk.f32.mxu0 %vm174_vm3, %v540_v56 }
 0x23b   :  { %v3166_v58 = vpop.f32.mrb[2].mxu1 }
 0x23c   :  { %v336_v59 = vadd.f32 %v3166_v58, %v263_v57  ;;  %v330_v60 = vpop.f32.mrb[3].mxu1 }
 0x23d   :  { %v331_v62 = vadd.f32 %v330_v60, %v263_v57 }
 0x23f   :  { %v3869_v0 = vpack.c.bf16 %v336_v59, %v331_v62 }
 0x241   :  { %3427 = vmatprep.subr.msk.bf16.mxu1 %vm3863_vm10, %v3869_v0  ;;  %3433 = vmatprep.subr.msk.bf16.mxu0 %vm3863_vm10, %v3869_v0 }
 0x242   :  { %3430 = vmatpush3.bf16.xpose.msk.msra.mxu1 %vm3863_vm10, %v3869_v0  ;;  %3436 = vmatpush3.bf16.xpose.msk.msra.mxu0 %vm3863_vm10, %v3869_v0 }
 0x243   :  { %v3177_v4 = vpop.f32.mrb[4].mxu1  ;;  %3447 = vmatprep.subr.msk.bf16.mxu0 %vm3863_vm10, %v3869_v0 }
 0x244   :  { %v419_v6 = vadd.f32 %v3177_v4, %v346_v2  ;;  %v413_v7 = vpop.f32.mrb[5].mxu1 }
 0x245   :  { %v414_v11 = vadd.f32 %v413_v7, %v346_v2 }
 0x246   :  { %v650_v12 = vmul.f32 %v3843_v51, %v419_v6  ;;  %v539_v13 = vmul.f32 %v3840_v50, %v419_v6  ;;  %v923_v14 = vmul.f32 %v3892_v5, %v419_v6  ;;  %v1117_v15 = vmul.f32 %v3895_v8, %v419_v6 }
 0x247   :  { %v649_v16 = vmul.f32 %v3843_v51, %v414_v11  ;;  %v538_v17 = vmul.f32 %v3840_v50, %v414_v11  ;;  %v922_v18 = vmul.f32 %v3892_v5, %v414_v11  ;;  %v1116_v19 = vmul.f32 %v3895_v8, %v414_v11 }
 0x249   :  { %3183 = vmatmul.mubr.msk.f32.vlgmr.msra.gmra.mrb[6].mxu1 %vm174_vm3, %v423_v9  ;;  %3190 = vmatmul.mubr.msk.f32.vlgmr.msra.gmra.mrb[2].mxu0 %vm174_vm3, %v541_v10  ;;  %v3437_v21 = vpack.c.bf16 %v650_v12, %v649_v16  ;;  %v3913_v22 = vpack.c.bf16 %v539_v13, %v538_v17  ;;  %v3915_v23 = vpack.c.bf16 %v923_v14, %v922_v18 }
 0x24a   :  { %3450 = vmatpush3.bf16.xpose.msk.msra.mxu0 %vm3863_vm10, %v3869_v0  ;;  %3210 = vmatprep.mubr.msk.f32.mxu0 %vm174_vm3, %v813_v20  ;;  %v3921_v24 = vpack.c.bf16 %v1117_v15, %v1116_v19 }
 0x24b   :  { %3438 = vmatprep.subr.bf16.mxu1 %v3437_v21 }
 0x24c   :  { %3440 = vmatpush3.bf16.msra.mxu1 %v3437_v21 }
 0x24d   :  { %3442 = vmatprep.subr.bf16.mxu1 %v3913_v22 }
 0x251   :  { %3211 = vmatmul.mubr.msk.f32.vlgmr.msra.gmra.mrb[4].mxu0 %vm174_vm3, %v814_v25 }
 0x31c   :  { %v3184_v32 = vpop.f32.mrb[6].mxu1  ;;  %v3191_v33 = vpop.f32.mrb[2].mxu0 }
 0x31d   :  { %v624_v34 = vmul.f32 0.35355338, %v3191_v33  ;;  %v502_v37 = vpop.f32.mrb[7].mxu1  ;;  %v614_v38 = vpop.f32.mrb[3].mxu0  ;;  %v512_v49 = vmul.f32 0.35355338, %v3184_v32 }
 0x31e   :  { %v511_v41 = vmul.f32 0.35355338, %v502_v37  ;;  %v623_v1 = vmul.f32 0.35355338, %v614_v38 }
 0x31f   :  { %v626_v43 = vadd.f32 %v624_v34, %v3933_v40  ;;  %v514_v62 = vadd.f32 %v512_v49, %v3933_v40 }
 0x320   :  { %v625_v44 = vadd.f32 %v623_v1, %v3935_v42  ;;  %v513_v55 = vadd.f32 %v511_v41, %v3935_v42 }
 0x321   :  { %v630_v48 = vsel %vm515_vm6, %v626_v43, -inf  ;;  %v519_v6 = vsel %vm515_vm6, %v514_v62, -inf }
 0x322   :  { %631 = vmax.xlane.f32.xlu1 %v630_v48  ;;  %v627_v52 = vsel %vm515_vm6, %v625_v44, -inf  ;;  %v516_v60 = vsel %vm515_vm6, %v513_v55, -inf }
 0x323   :  { %628 = vmax.xlane.f32.xlu0 %v627_v52 }
 0x324   :  { %v3212_v56 = vpop.f32.mrb[4].mxu0 }
 0x325   :  { %v887_v57 = vpop.f32.mrb[5].mxu0  ;;  %v897_v58 = vmul.f32 0.35355338, %v3212_v56 }
 0x326   :  { %v896_v59 = vmul.f32 0.35355338, %v887_v57 }
 0x327   :  { %517 = vmax.xlane.f32.xlu0 %v516_v60  ;;  %v899_v7 = vadd.f32 %v897_v58, %v3933_v40 }
 0x328   :  { %v898_v2 = vadd.f32 %v896_v59, %v3935_v42 }
 0x329   :  { %v903_v9 = vsel %vm515_vm6, %v899_v7, -inf }
 0x32a   :  { %v900_v4 = vsel %vm515_vm6, %v898_v2, -inf }
 0x32b   :  { %901 = vmax.xlane.f32.xlu1 %v900_v4  ;;  %520 = vmax.xlane.f32.xlu0 %v519_v6 }
 0x32f   :  { %904 = vmax.xlane.f32.xlu0 %v903_v9 }
 0x3af   :  { %v632_v10 = vpop.xlane.xlu1 %631 }
 0x3b0   :  { %v634_v11 = vsub.f32 %v626_v43, %v632_v10  ;;  %v629_v12 = vpop.xlane.xlu0 %628 }
 0x3b1   :  { %v633_v13 = vsub.f32 %v625_v44, %v629_v12 }
 0x3b2   :  { %v637_v14 = vmul.f32 1.442695, %v634_v11 }
 0x3b3   :  { %v635_v15 = vmul.f32 1.442695, %v633_v13  ;;  %v1007_v13 = vmul.f32 %v3895_v8, %v3848_v54 }
 0x3b4   :  { %3601 = vpow2.f32 %v637_v14  ;;  %v518_v16 = vpop.xlane.xlu0 %517 }
 0x3b5   :  { %3603 = vpow2.f32 %v635_v15  ;;  %v522_v17 = vsub.f32 %v513_v55, %v518_v16 }
 0x3b7   :  { %v524_v18 = vmul.f32 1.442695, %v522_v17 }
 0x3b8   :  { %v902_v19 = vpop.xlane.xlu1 %901  ;;  %v521_v20 = vpop.xlane.xlu0 %520 }
 0x3b9   :  { %3605 = vpow2.f32 %v524_v18  ;;  %v906_v21 = vsub.f32 %v898_v2, %v902_v19  ;;  %v523_v25 = vsub.f32 %v514_v62, %v521_v20 }
 0x3bb   :  { %v908_v26 = vmul.f32 1.442695, %v906_v21  ;;  %v526_v27 = vmul.f32 1.442695, %v523_v25 }
 0x3bc   :  { %v905_v28 = vpop.xlane.xlu0 %904 }
 0x3bd   :  { %3607 = vpow2.f32 %v908_v26  ;;  %v907_v29 = vsub.f32 %v899_v7, %v905_v28 }
 0x3be   :  { %v3602_v30 = vpop.eup %3601  ;;  %3609 = vpow2.f32 %v526_v27 }
 0x3bf   :  { %v3604_v31 = vpop.eup %3603  ;;  %v910_v32 = vmul.f32 1.442695, %v907_v29  ;;  %v642_v33 = vsel %vm515_vm6, %v3602_v30, 0.0 }
 0x3c0   :  { %643 = vadd.xlane.f32.xlu0 %v642_v33  ;;  %v639_v34 = vsel %vm515_vm6, %v3604_v31, 0.0 }
 0x3c1   :  { %3611 = vpow2.f32 %v910_v32  ;;  %640 = vadd.xlane.f32.xlu1 %v639_v34  ;;  %v1421_v32 = vld [vmem:[%s4304_s1 + $0xf0] sm:$0xff]  ;;  %v1201_v34 = vld [vmem:[%s4304_s1 + $0xa8] sm:$0xff] }
 0x3c3   :  { %v3606_v37 = vpop.eup %3605 }
 0x3c4   :  { %v528_v38 = vsel %vm515_vm6, %v3606_v37, 0.0 }
 0x3c5   :  { %529 = vadd.xlane.f32.xlu1 %v528_v38  ;;  %v1203_v38 = vld [vmem:[%s4304_s1 + $0xb8] sm:$0xff] }
 0x3c7   :  { %v3608_v39 = vpop.eup %3607 }
 0x3c8   :  { %v3610_v41 = vpop.eup %3609  ;;  %v912_v1 = vsel %vm515_vm6, %v3608_v39, 0.0 }
 0x3c9   :  { %913 = vadd.xlane.f32.xlu1 %v912_v1  ;;  %v531_v43 = vsel %vm515_vm6, %v3610_v41, 0.0 }
 0x3ca   :  { %532 = vadd.xlane.f32.xlu0 %v531_v43 }
 0x3cb   :  { %v3612_v44 = vpop.eup %3611 }
 0x3cc   :  { %v915_v48 = vsel %vm515_vm6, %v3612_v44, 0.0 }
 0x3ce   :  { %916 = vadd.xlane.f32.xlu0 %v915_v48 }
 0x44d   :  { %v644_v49 = vpop.xlane.xlu0 %643 }
 0x44e   :  { %3613 = vrcp.f32 %v644_v49  ;;  %v641_v52 = vpop.xlane.xlu1 %640  ;;  %v1422_v49 = vld [vmem:[%s4304_s1 + $0xf8] sm:$0xff] }
 0x44f   :  { %3615 = vrcp.f32 %v641_v52  ;;  %v1423_v52 = vld [vmem:[%s4304_s1 + $0x100] sm:$0xff] }
 0x452   :  { %v530_v55 = vpop.xlane.xlu1 %529 }
 0x453   :  { %3617 = vrcp.f32 %v530_v55 }
 0x456   :  { %v914_v56 = vpop.xlane.xlu1 %913 }
 0x457   :  { %3619 = vrcp.f32 %v914_v56  ;;  %v533_v57 = vpop.xlane.xlu0 %532 }
 0x458   :  { %v3614_v58 = vpop.eup %3613  ;;  %3621 = vrcp.f32 %v533_v57 }
 0x459   :  { %v3616_v59 = vpop.eup %3615  ;;  %v648_v62 = vmul.f32 %v3614_v58, %v3602_v30  ;;  %v3485_v58 = vpack.c.bf16 %v1423_v52, %v1422_v49  ;;  %v4057_v49 = vld [vmem:[%s4304_s1 + $0x1d0] sm:$0xff]  ;;  %v1327_v52 = vsub.s32 4, %v3824_v45 }
 0x45a   :  { %v647_v60 = vmul.f32 %v3616_v59, %v3604_v31  ;;  %v1420_v31 = vld [vmem:[%s4304_s1 + $0xe8] sm:$0xff] }
 0x45b   :  { %v917_v2 = vpop.xlane.xlu0 %916  ;;  %v3481_v33 = vpack.c.bf16 %v1421_v32, %v1420_v31  ;;  %v1333_v31 = vld [vmem:[%s4304_s1 + $0xd8] sm:$0xff]  ;;  %v1334_v32 = vld [vmem:[%s4304_s1 + $0xe0] sm:$0xff] }
 0x45c   :  { %3196 = vmatprep.mubr.msk.f32.mxu1 %vm515_vm6, %v647_v60  ;;  %3623 = vrcp.f32 %v917_v2 }
 0x45d   :  { %v3618_v4 = vpop.eup %3617  ;;  %3197 = vmatmul.mubr.msk.f32.vlgmr.msra.gmra.mrb[8].mxu1 %vm515_vm6, %v648_v62  ;;  %v1426_v62 = vsub.s32 5, %v3824_v45 }
 0x45e   :  { %3444 = vmatpush3.bf16.msra.mxu1 %v3913_v22  ;;  %v536_v6 = vmul.f32 %v3618_v4, %v3606_v37  ;;  %v1202_v37 = vld [vmem:[%s4304_s1 + $0xb0] sm:$0xff] }
 0x45f   :  { %3452 = vmatprep.subr.bf16.mxu1 %v3915_v23  ;;  %v1427_v2 = vrot.slane %v3834_v47, %v1426_v62 }
 0x460   :  { %3203 = vmatprep.mubr.msk.f32.mxu1 %vm515_vm6, %v536_v6 }
 0x461   :  { %v3620_v7 = vpop.eup %3619 }
 0x462   :  { %v3622_v9 = vpop.eup %3621  ;;  %v920_v11 = vmul.f32 %v3620_v7, %v3608_v39  ;;  %v3465_v39 = vpack.c.bf16 %v1202_v37, %v1201_v34  ;;  %v1503_v34 = vld [vmem:[%s4304_s1 + $0x108] sm:$0xff]  ;;  %v1504_v37 = vld [vmem:[%s4304_s1 + $0x110] sm:$0xff] }
 0x463   :  { %v537_v10 = vmul.f32 %v3622_v9, %v3610_v41  ;;  %v1204_v41 = vld [vmem:[%s4304_s1 + $0xc0] sm:$0xff] }
 0x464   :  { %v3469_v1 = vpack.c.bf16 %v1204_v41, %v1203_v38  ;;  %3466 = vmatprep.subr.bf16.mxu0 %v3465_v39  ;;  %v3489_v38 = vpack.c.bf16 %v1504_v37, %v1503_v34 }
 0x465   :  { %3204 = vmatmul.mubr.msk.f32.vlgmr.msra.gmra.mrb[8].mxu1 %vm515_vm6, %v537_v10  ;;  %3468 = vmatpush3.bf16.msra.mxu0 %v3465_v39 }
 0x466   :  { %3454 = vmatpush3.bf16.msra.mxu1 %v3915_v23  ;;  %3217 = vmatprep.mubr.msk.f32.mxu1 %vm515_vm6, %v920_v11  ;;  %v3624_v22 = vpop.eup %3623  ;;  %v1008_v23 = vmul.f32 %v3895_v8, %v3874_v3  ;;  %v1207_v11 = vsub.s32 3, %v3824_v45 }
 0x467   :  { %3457 = vmatprep.subr.msk.bf16.mxu1 %vm3863_vm10, %v3869_v0  ;;  %v921_v12 = vmul.f32 %v3624_v22, %v3612_v44  ;;  %3470 = vmatprep.subr.bf16.mxu0 %v3469_v1 }
 0x468   :  { %v1208_v22 = vrot.slane %v3834_v47, %v1207_v11 }
 0x469   :  { %3472 = vmatpush3.bf16.msra.mxu0 %v3469_v1 }
 0x46d   :  { %3218 = vmatmul.mubr.msk.f32.vlgmr.msra.gmra.mrb[8].mxu1 %vm515_vm6, %v921_v12 }
 0x46e   :  { %3224 = vmatprep.mubr.msk.f32.mxu1 %vm174_vm3, %v1007_v13 }
 0x46f   :  { %3460 = vmatpush3.bf16.xpose.msk.msra.mxu1 %vm3863_vm10, %v3869_v0 }
 0x470   :  { %3462 = vmatprep.subr.bf16.mxu1 %v3921_v24 }
 0x476   :  { %3225 = vmatmul.mubr.msk.f32.vlgmr.msra.gmra.mrb[10].mxu1 %vm174_vm3, %v1008_v23 }
 0x477   :  { %3464 = vmatpush3.bf16.msra.mxu1 %v3921_v24 }
 0x478   :  { %3482 = vmatprep.subr.bf16.mxu1 %v3481_v33 }
 0x549   :  { %v3226_v14 = vpop.f32.mrb[10].mxu1 }
 0x54a   :  { %v1091_v15 = vmul.f32 0.35355338, %v3226_v14  ;;  %v1081_v54 = vpop.f32.mrb[11].mxu1 }
 0x54b   :  { %v1090_v16 = vmul.f32 0.35355338, %v1081_v54 }
 0x54c   :  { %v1093_v17 = vadd.f32 %v1091_v15, %v3933_v40 }
 0x54d   :  { %v1092_v18 = vadd.f32 %v1090_v16, %v3935_v42 }
 0x54e   :  { %v1097_v19 = vsel %vm515_vm6, %v1093_v17, -inf }
 0x54f   :  { %1098 = vmax.xlane.f32.xlu0 %v1097_v19  ;;  %v1094_v0 = vsel %vm515_vm6, %v1092_v18, -inf }
 0x550   :  { %1095 = vmax.xlane.f32.xlu1 %v1094_v0 }
 0x5dc   :  { %v1099_v20 = vpop.xlane.xlu0 %1098 }
 0x5dd   :  { %v1101_v3 = vsub.f32 %v1093_v17, %v1099_v20  ;;  %v1096_v21 = vpop.xlane.xlu1 %1095 }
 0x5de   :  { %v1100_v25 = vsub.f32 %v1092_v18, %v1096_v21 }
 0x5df   :  { %v1104_v26 = vmul.f32 1.442695, %v1101_v3 }
 0x5e0   :  { %v1102_v24 = vmul.f32 1.442695, %v1100_v25 }
 0x5e1   :  { %3625 = vpow2.f32 %v1104_v26 }
 0x5e2   :  { %3627 = vpow2.f32 %v1102_v24 }
 0x5eb   :  { %v3626_v27 = vpop.eup %3625 }
 0x5ec   :  { %v3628_v28 = vpop.eup %3627  ;;  %v1109_v29 = vsel %vm515_vm6, %v3626_v27, 0.0 }
 0x5ed   :  { %1110 = vadd.xlane.f32.xlu0 %v1109_v29  ;;  %v1106_v30 = vsel %vm515_vm6, %v3628_v28, 0.0  ;;  %v1332_v29 = vld [vmem:[%s4304_s1 + $0xd0] sm:$0xff] }
 0x5ee   :  { %1107 = vadd.xlane.f32.xlu1 %v1106_v30 }
 0x67a   :  { %v1111_v43 = vpop.xlane.xlu0 %1110 }
 0x67b   :  { %3629 = vrcp.f32 %v1111_v43  ;;  %v1108_v44 = vpop.xlane.xlu1 %1107 }
 0x67c   :  { %3631 = vrcp.f32 %v1108_v44 }
 0x685   :  { %v3630_v48 = vpop.eup %3629 }
 0x686   :  { %v3632_v55 = vpop.eup %3631  ;;  %v1115_v57 = vmul.f32 %v3630_v48, %v3626_v27 }
 0x687   :  { %v1114_v56 = vmul.f32 %v3632_v55, %v3628_v28  ;;  %v1331_v28 = vld [vmem:[%s4304_s1 + $0xc8] sm:$0xff]  ;;  %v1322_v55 = vrot.slane %v4057_v49, %v1207_v11 }
 0x688   :  { %v3473_v30 = vpack.c.bf16 %v1332_v29, %v1331_v28 }
 0x689   :  { %3231 = vmatprep.mubr.msk.f32.mxu1 %vm515_vm6, %v1114_v56 }
 0x68a   :  { %3232 = vmatmul.mubr.msk.f32.vlgmr.msra.gmra.mrb[8].mxu1 %vm515_vm6, %v1115_v57  ;;  %3474 = vmatprep.subr.bf16.mxu0 %v3473_v30 }
 0x68b   :  { %3484 = vmatpush3.bf16.msra.mxu1 %v3481_v33  ;;  %3264 = vmatprep.mubr.msk.f32.mxu1 %vm174_vm3, %v3794_v35  ;;  %v3477_v33 = vpack.c.bf16 %v1334_v32, %v1333_v31 }
 0x68c   :  { %3486 = vmatprep.subr.bf16.mxu1 %v3485_v58 }
 0x68f   :  { %3488 = vmatpush3.bf16.msra.mxu1 %v3485_v58 }
 0x692   :  { %3265 = vmatmul.mubr.msk.f32.vlgmr.msra.gmra.mrb[12].mxu1 %vm174_vm3, %v3796_v36 }
 0x75d   :  { %v3233_v59 = vpop.f32.mrb[8].mxu1 }
 0x75e   :  { %v1190_v60 = vpop.f32.mrb[9].mxu1 }
 0x75f   :  { %3242 = vmatprep.mubr.msk.f32.mxu0 %vm174_vm3, %v1190_v60  ;;  %v1328_v60 = vrot.slane %v4057_v49, %v1327_v52 }
 0x760   :  { %3243 = vmatmul.mubr.msk.f32.vlgmr.msra.gmra.mrb[6].mxu0 %vm174_vm3, %v3233_v59 }
 0x761   :  { %3476 = vmatpush3.bf16.msra.mxu0 %v3473_v30 }
 0x762   :  { %3478 = vmatprep.subr.bf16.mxu0 %v3477_v33 }
 0x765   :  { %v3266_v4 = vpop.f32.mrb[12].mxu1  ;;  %3480 = vmatpush3.bf16.msra.mxu0 %v3477_v33 }
 0x766   :  { %v1500_v6 = vadd.f32 %v3266_v4, %v1427_v2  ;;  %v1494_v7 = vpop.f32.mrb[13].mxu1  ;;  %3490 = vmatprep.subr.bf16.mxu0 %v3489_v38 }
 0x767   :  { %v1495_v9 = vadd.f32 %v1494_v7, %v1427_v2  ;;  %v1506_v7 = vld [vmem:[%s4304_s1 + $0x120] sm:$0xff] }
 0x769   :  { %v4020_v10 = vpack.c.bf16 %v1500_v6, %v1495_v9  ;;  %v1505_v6 = vld [vmem:[%s4304_s1 + $0x118] sm:$0xff] }
 0x76a   :  { %v3493_v11 = vpack.c.bf16 %v1506_v7, %v1505_v6 }
 0x76b   :  { %3499 = vmatprep.subr.msk.bf16.mxu1 %vm3863_vm10, %v4020_v10 }
 0x76c   :  { %3502 = vmatpush3.bf16.xpose.msk.msra.mxu1 %vm3863_vm10, %v4020_v10 }
 0x833   :  { %v3244_v12 = vpop.f32.mrb[6].mxu0 }
 0x834   :  { %v1287_v13 = vadd.f32 %v3244_v12, %v1208_v22  ;;  %v1281_v23 = vpop.f32.mrb[7].mxu0  ;;  %v1338_v12 = vrot.slane %v3834_v47, %v1327_v52 }
 0x835   :  { %v1282_v14 = vadd.f32 %v1281_v23, %v1208_v22 }
 0x836   :  { %v1291_v15 = vadd.f32 %v1287_v13, %v3796_v36 }
 0x837   :  { %v1290_v54 = vadd.f32 %v1282_v14, %v3794_v35  ;;  %v1509_v14 = vsub.s32 6, %v3824_v45 }
 0x838   :  { %v1295_v16 = vsel %vm174_vm3, %v1291_v15, 0.0 }
 0x839   :  { %1296 = vadd.xlane.f32.xlu0 %v1295_v16  ;;  %v1292_v17 = vsel %vm174_vm3, %v1290_v54, 0.0 }
 0x83a   :  { %1293 = vadd.xlane.f32.xlu1 %v1292_v17 }
 0x8c6   :  { %v1297_v18 = vpop.xlane.xlu0 %1296 }
 0x8c7   :  { %v1300_v19 = vmul.f32 0.03125, %v1297_v18  ;;  %v1294_v0 = vpop.xlane.xlu1 %1293  ;;  %v1510_v18 = vrot.slane %v3834_v47, %v1509_v14 }
 0x8c8   :  { %v1299_v20 = vmul.f32 0.03125, %v1294_v0 }
 0x8c9   :  { %v1302_v3 = vsub.f32 %v1291_v15, %v1300_v19 }
 0x8ca   :  { %v1301_v21 = vsub.f32 %v1290_v54, %v1299_v20 }
 0x8cb   :  { %v1304_v25 = vmul.f32 %v1302_v3, %v1302_v3 }
 0x8cc   :  { %v1303_v26 = vmul.f32 %v1301_v21, %v1301_v21 }
 0x8cd   :  { %v1308_v24 = vsel %vm174_vm3, %v1304_v25, 0.0 }
 0x8ce   :  { %1309 = vadd.xlane.f32.xlu0 %v1308_v24  ;;  %v1305_v27 = vsel %vm174_vm3, %v1303_v26, 0.0 }
 0x8cf   :  { %1306 = vadd.xlane.f32.xlu1 %v1305_v27 }
 0x95b   :  { %v1310_v39 = vpop.xlane.xlu0 %1309 }
 0x95c   :  { %v1312_v41 = vmul.f32 0.03125, %v1310_v39  ;;  %v1307_v1 = vpop.xlane.xlu1 %1306 }
 0x95d   :  { %v1311_v43 = vmul.f32 0.03125, %v1307_v1 }
 0x95e   :  { %v1314_v44 = vadd.f32 1e-05, %v1312_v41 }
 0x95f   :  { %v1313_v48 = vadd.f32 1e-05, %v1311_v43 }
 0x960   :  { %3633 = vrsqrt.f32 %v1314_v44 }
 0x961   :  { %3635 = vrsqrt.f32 %v1313_v48 }
 0x96a   :  { %v3634_v56 = vpop.eup %3633 }
 0x96b   :  { %v3636_v57 = vpop.eup %3635  ;;  %v1318_v58 = vmul.f32 %v3634_v56, %v1302_v3 }
 0x96c   :  { %v1317_v59 = vmul.f32 %v3636_v57, %v1301_v21 }
 0x96d   :  { %v1324_v2 = vmul.f32 %v1322_v55, %v1318_v58 }
 0x96e   :  { %v1323_v4 = vmul.f32 %v1322_v55, %v1317_v59 }
 0x96f   :  { %v4070_v22 = vadd.f32 %v1328_v60, %v1324_v2 }
 0x970   :  { %v4068_v9 = vadd.f32 %v1328_v60, %v1323_v4 }
 0x972   :  { %3253 = vmatprep.mubr.msk.f32.mxu0 %vm174_vm3, %v4068_v9 }
 0x973   :  { %3254 = vmatmul.mubr.msk.f32.vlgmr.msra.gmra.mrb[8].mxu0 %vm174_vm3, %v4070_v22 }
 0x974   :  { %3492 = vmatpush3.bf16.msra.mxu0 %v3489_v38  ;;  %3275 = vmatprep.mubr.msk.f32.mxu0 %vm174_vm3, %v3794_v35 }
 0x975   :  { %3494 = vmatprep.subr.bf16.mxu0 %v3493_v11 }
 0x978   :  { %3496 = vmatpush3.bf16.msra.mxu0 %v3493_v11 }
 0x979   :  { %3505 = vmatprep.subr.msk.bf16.mxu0 %vm3863_vm10, %v4020_v10 }
 0x97b   :  { %3276 = vmatmul.mubr.msk.f32.vlgmr.msra.gmra.mrb[10].mxu0 %vm174_vm3, %v3796_v36 }
 0x981   :  { %3508 = vmatpush3.bf16.xpose.msk.msra.mxu0 %vm3863_vm10, %v4020_v10 }
 0x982   :  { %3519 = vmatprep.subr.msk.bf16.mxu0 %vm3863_vm10, %v4020_v10 }
 0xa46   :  { %v3255_v35 = vpop.f32.mrb[8].mxu0 }
 0xa47   :  { %v4090_v13 = vadd.f32 %v3255_v35, %v1338_v12  ;;  %v1411_v23 = vpop.f32.mrb[9].mxu0 }
 0xa48   :  { %v4093_v15 = vadd.f32 %v1411_v23, %v1338_v12 }
 0xa49   :  { %v1587_v16 = vmul.f32 %v3840_v50, %v4090_v13  ;;  %v1704_v17 = vmul.f32 %v3843_v51, %v4090_v13  ;;  %v1977_v31 = vmul.f32 %v3892_v5, %v4090_v13 }
 0xa4a   :  { %v1586_v36 = vmul.f32 %v3840_v50, %v4093_v15  ;;  %v1703_v54 = vmul.f32 %v3843_v51, %v4093_v15  ;;  %v1976_v19 = vmul.f32 %v3892_v5, %v4093_v15 }
 0xa4c   :  { %3282 = vmatprep.mubr.msk.f32.mxu1 %vm174_vm3, %v1586_v36  ;;  %3289 = vmatprep.mubr.msk.f32.mxu0 %vm174_vm3, %v1703_v54 }
 0xa4d   :  { %3283 = vmatmul.mubr.msk.f32.vlgmr.msra.gmra.mrb[14].mxu1 %vm174_vm3, %v1587_v16  ;;  %3290 = vmatmul.mubr.msk.f32.vlgmr.msra.gmra.mrb[12].mxu0 %vm174_vm3, %v1704_v17 }
 0xa4e   :  { %v3277_v0 = vpop.f32.mrb[10].mxu0  ;;  %3522 = vmatpush3.bf16.xpose.msk.msra.mxu0 %vm3863_vm10, %v4020_v10  ;;  %3310 = vmatprep.mubr.msk.f32.mxu0 %vm174_vm3, %v1976_v19 }
 0xa4f   :  { %v1583_v20 = vadd.f32 %v3277_v0, %v1510_v18  ;;  %v1577_v47 = vpop.f32.mrb[11].mxu0 }
 0xa50   :  { %v1578_v3 = vadd.f32 %v1577_v47, %v1510_v18 }
 0xa51   :  { %v1813_v21 = vmul.f32 %v3843_v51, %v1583_v20  ;;  %v1702_v25 = vmul.f32 %v3840_v50, %v1583_v20  ;;  %v2086_v26 = vmul.f32 %v3892_v5, %v1583_v20  ;;  %v2280_v24 = vmul.f32 %v3895_v8, %v1583_v20 }
 0xa52   :  { %v1812_v27 = vmul.f32 %v3843_v51, %v1578_v3  ;;  %v1701_v28 = vmul.f32 %v3840_v50, %v1578_v3  ;;  %v2085_v29 = vmul.f32 %v3892_v5, %v1578_v3  ;;  %v2279_v30 = vmul.f32 %v3895_v8, %v1578_v3 }
 0xa54   :  { %v3509_v32 = vpack.c.bf16 %v1813_v21, %v1812_v27  ;;  %v4126_v33 = vpack.c.bf16 %v1702_v25, %v1701_v28  ;;  %v4128_v34 = vpack.c.bf16 %v2086_v26, %v2085_v29  ;;  %v4130_v37 = vpack.c.bf16 %v2280_v24, %v2279_v30 }
 0xa55   :  { %3311 = vmatmul.mubr.msk.f32.vlgmr.msra.gmra.mrb[14].mxu0 %vm174_vm3, %v1977_v31 }
 0xa56   :  { %3510 = vmatprep.subr.bf16.mxu1 %v3509_v32 }
 0xa57   :  { %3512 = vmatpush3.bf16.msra.mxu1 %v3509_v32 }
 0xa58   :  { %3514 = vmatprep.subr.bf16.mxu1 %v4126_v33 }
 0xb20   :  { %v3284_v50 = vpop.f32.mrb[14].mxu1  ;;  %v3291_v51 = vpop.f32.mrb[12].mxu0 }
 0xb21   :  { %v1676_v38 = vmul.f32 0.35355338, %v3284_v50  ;;  %v1787_v39 = vmul.f32 0.35355338, %v3291_v51  ;;  %v1666_v41 = vpop.f32.mrb[15].mxu1  ;;  %v1777_v1 = vpop.f32.mrb[13].mxu0 }
 0xb22   :  { %v1675_v5 = vmul.f32 0.35355338, %v1666_v41  ;;  %v1786_v43 = vmul.f32 0.35355338, %v1777_v1 }
 0xb23   :  { %v1789_v44 = vadd.f32 %v1787_v39, %v3933_v40  ;;  %v1678_v55 = vadd.f32 %v1676_v38, %v3933_v40 }
 0xb24   :  { %v1788_v48 = vadd.f32 %v1786_v43, %v3935_v42  ;;  %v1677_v57 = vadd.f32 %v1675_v5, %v3935_v42 }
 0xb25   :  { %v1793_v52 = vsel %vm515_vm6, %v1789_v44, -inf  ;;  %v1682_v2 = vsel %vm515_vm6, %v1678_v55, -inf }
 0xb26   :  { %1794 = vmax.xlane.f32.xlu0 %v1793_v52  ;;  %v1790_v56 = vsel %vm515_vm6, %v1788_v48, -inf  ;;  %v1679_v6 = vsel %vm515_vm6, %v1677_v57, -inf }
 0xb27   :  { %1791 = vmax.xlane.f32.xlu1 %v1790_v56 }
 0xb28   :  { %v3312_v58 = vpop.f32.mrb[14].mxu0 }
 0xb29   :  { %v2060_v59 = vmul.f32 0.35355338, %v3312_v58  ;;  %v2050_v60 = vpop.f32.mrb[15].mxu0 }
 0xb2a   :  { %v2059_v4 = vmul.f32 0.35355338, %v2050_v60  ;;  %1683 = vmax.xlane.f32.xlu0 %v1682_v2 }
 0xb2b   :  { %1680 = vmax.xlane.f32.xlu1 %v1679_v6  ;;  %v2062_v7 = vadd.f32 %v2060_v59, %v3933_v40 }
 0xb2c   :  { %v2061_v11 = vadd.f32 %v2059_v4, %v3935_v42 }
 0xb2d   :  { %v2066_v12 = vsel %vm515_vm6, %v2062_v7, -inf }
 0xb2e   :  { %2067 = vmax.xlane.f32.xlu0 %v2066_v12  ;;  %v2063_v35 = vsel %vm515_vm6, %v2061_v11, -inf }
 0xb2f   :  { %2064 = vmax.xlane.f32.xlu1 %v2063_v35 }
 0xbb3   :  { %v1795_v23 = vpop.xlane.xlu0 %1794 }
 0xbb4   :  { %v1797_v36 = vsub.f32 %v1789_v44, %v1795_v23  ;;  %v1792_v54 = vpop.xlane.xlu1 %1791 }
 0xbb5   :  { %v1796_v16 = vsub.f32 %v1788_v48, %v1792_v54  ;;  %v2170_v54 = vmul.f32 %v3895_v8, %v4093_v15 }
 0xbb6   :  { %v1800_v17 = vmul.f32 1.442695, %v1797_v36 }
 0xbb7   :  { %v1798_v18 = vmul.f32 1.442695, %v1796_v16  ;;  %v1684_v19 = vpop.xlane.xlu0 %1683 }
 0xbb8   :  { %3637 = vpow2.f32 %v1800_v17  ;;  %v1686_v0 = vsub.f32 %v1678_v55, %v1684_v19  ;;  %v1681_v20 = vpop.xlane.xlu1 %1680 }
 0xbb9   :  { %3639 = vpow2.f32 %v1798_v18  ;;  %v1685_v47 = vsub.f32 %v1677_v57, %v1681_v20 }
 0xbba   :  { %v1689_v3 = vmul.f32 1.442695, %v1686_v0 }
 0xbbb   :  { %v1687_v21 = vmul.f32 1.442695, %v1685_v47  ;;  %v2068_v25 = vpop.xlane.xlu0 %2067 }
 0xbbc   :  { %3641 = vpow2.f32 %v1689_v3  ;;  %v2070_v26 = vsub.f32 %v2062_v7, %v2068_v25  ;;  %v2065_v24 = vpop.xlane.xlu1 %2064 }
 0xbbd   :  { %3643 = vpow2.f32 %v1687_v21  ;;  %v2069_v27 = vsub.f32 %v2061_v11, %v2065_v24  ;;  %v2365_v24 = vld [vmem:[%s4304_s1 + $0x130] sm:$0xff] }
 0xbbe   :  { %v2073_v28 = vmul.f32 1.442695, %v2070_v26  ;;  %v2364_v26 = vld [vmem:[%s4304_s1 + $0x128] sm:$0xff] }
 0xbbf   :  { %v2071_v29 = vmul.f32 1.442695, %v2069_v27  ;;  %v2366_v27 = vld [vmem:[%s4304_s1 + $0x138] sm:$0xff] }
 0xbc0   :  { %3645 = vpow2.f32 %v2073_v28  ;;  %v3537_v28 = vpack.c.bf16 %v2365_v24, %v2364_v26 }
 0xbc1   :  { %3647 = vpow2.f32 %v2071_v29  ;;  %v2367_v29 = vld [vmem:[%s4304_s1 + $0x140] sm:$0xff] }
 0xbc2   :  { %v3638_v30 = vpop.eup %3637  ;;  %3538 = vmatprep.subr.bf16.mxu0 %v3537_v28 }
 0xbc3   :  { %v3640_v31 = vpop.eup %3639  ;;  %v1805_v32 = vsel %vm515_vm6, %v3638_v30, 0.0  ;;  %3540 = vmatpush3.bf16.msra.mxu0 %v3537_v28 }
 0xbc4   :  { %1806 = vadd.xlane.f32.xlu0 %v1805_v32  ;;  %v1802_v50 = vsel %vm515_vm6, %v3640_v31, 0.0 }
 0xbc5   :  { %1803 = vadd.xlane.f32.xlu1 %v1802_v50 }
 0xbc6   :  { %v3642_v51 = vpop.eup %3641 }
 0xbc7   :  { %v3644_v38 = vpop.eup %3643  ;;  %v1694_v39 = vsel %vm515_vm6, %v3642_v51, 0.0 }
 0xbc8   :  { %1695 = vadd.xlane.f32.xlu0 %v1694_v39  ;;  %v1691_v41 = vsel %vm515_vm6, %v3644_v38, 0.0 }
 0xbc9   :  { %1692 = vadd.xlane.f32.xlu1 %v1691_v41 }
 0xbca   :  { %v3646_v1 = vpop.eup %3645 }
 0xbcb   :  { %v3648_v5 = vpop.eup %3647  ;;  %v2078_v43 = vsel %vm515_vm6, %v3646_v1, 0.0 }
 0xbcc   :  { %2079 = vadd.xlane.f32.xlu0 %v2078_v43  ;;  %v2075_v44 = vsel %vm515_vm6, %v3648_v5, 0.0  ;;  %v3677_v43 = vld [vmem:[%s4304_s1 + $0x1c8] sm:$0xff] }
 0xbcd   :  { %2076 = vadd.xlane.f32.xlu1 %v2075_v44 }
 0xc51   :  { %v1807_v48 = vpop.xlane.xlu0 %1806 }
 0xc52   :  { %3649 = vrcp.f32 %v1807_v48  ;;  %v1804_v52 = vpop.xlane.xlu1 %1803 }
 0xc53   :  { %3651 = vrcp.f32 %v1804_v52 }
 0xc55   :  { %v1696_v56 = vpop.xlane.xlu0 %1695 }
 0xc56   :  { %v1693_v55 = vpop.xlane.xlu1 %1692 }
 0xc57   :  { %3653 = vrcp.f32 %v1693_v55 }
 0xc58   :  { %3655 = vrcp.f32 %v1696_v56 }
 0xc59   :  { %v2080_v4 = vpop.xlane.xlu0 %2079 }
 0xc5a   :  { %v2077_v57 = vpop.xlane.xlu1 %2076 }
 0xc5b   :  { %3657 = vrcp.f32 %v2077_v57 }
 0xc5c   :  { %v3650_v58 = vpop.eup %3649  ;;  %3659 = vrcp.f32 %v2080_v4 }
 0xc5d   :  { %v3652_v59 = vpop.eup %3651  ;;  %v1811_v2 = vmul.f32 %v3650_v58, %v3638_v30  ;;  %v3541_v30 = vpack.c.bf16 %v2367_v29, %v2366_v27  ;;  %v2490_v27 = vrot.slane %v4057_v49, %v1509_v14  ;;  %v2676_v14 = vld [vmem:[%s4304_s1 + $0x1c0] sm:$0xff] }
 0xc5e   :  { %v1810_v60 = vmul.f32 %v3652_v59, %v3640_v31 }
 0xc5f   :  { %3542 = vmatprep.subr.bf16.mxu0 %v3541_v30 }
 0xc60   :  { %3296 = vmatprep.mubr.msk.f32.mxu1 %vm515_vm6, %v1810_v60  ;;  %3544 = vmatpush3.bf16.msra.mxu0 %v3541_v30 }
 0xc61   :  { %v3654_v6 = vpop.eup %3653  ;;  %3297 = vmatmul.mubr.msk.f32.vlgmr.msra.gmra.mrb[16].mxu1 %vm515_vm6, %v1811_v2 }
 0xc62   :  { %3516 = vmatpush3.bf16.msra.mxu1 %v4126_v33  ;;  %v1699_v7 = vmul.f32 %v3654_v6, %v3644_v38  ;;  %v3656_v11 = vpop.eup %3655 }
 0xc63   :  { %3524 = vmatprep.subr.bf16.mxu1 %v4128_v34  ;;  %v1700_v35 = vmul.f32 %v3656_v11, %v3642_v51 }
 0xc64   :  { %3303 = vmatprep.mubr.msk.f32.mxu1 %vm515_vm6, %v1699_v7 }
 0xc65   :  { %v3658_v12 = vpop.eup %3657 }
 0xc66   :  { %v2083_v23 = vmul.f32 %v3658_v12, %v3648_v5  ;;  %v3660_v33 = vpop.eup %3659  ;;  %v2370_v5 = vsub.s32 7, %v3824_v45 }
 0xc67   :  { %v2084_v36 = vmul.f32 %v3660_v33, %v3646_v1 }
 0xc68   :  { %v2371_v44 = vrot.slane %v3677_v43, %v2370_v5  ;;  %v2500_v43 = vrot.slane %v4057_v49, %v3827_v46 }
 0xc69   :  { %3304 = vmatmul.mubr.msk.f32.vlgmr.msra.gmra.mrb[16].mxu1 %vm515_vm6, %v1700_v35 }
 0xc6a   :  { %3526 = vmatpush3.bf16.msra.mxu1 %v4128_v34  ;;  %3317 = vmatprep.mubr.msk.f32.mxu1 %vm515_vm6, %v2083_v23  ;;  %v2171_v34 = vmul.f32 %v3895_v8, %v4090_v13 }
 0xc6b   :  { %3529 = vmatprep.subr.msk.bf16.mxu1 %vm3863_vm10, %v4020_v10 }
 0xc71   :  { %3318 = vmatmul.mubr.msk.f32.vlgmr.msra.gmra.mrb[16].mxu1 %vm515_vm6, %v2084_v36  ;;  %v2494_v36 = vld [vmem:[%s4304_s1 + $0x150] sm:$0xff] }
 0xc72   :  { %3324 = vmatprep.mubr.msk.f32.mxu1 %vm174_vm3, %v2170_v54  ;;  %v2584_v54 = vld [vmem:[%s4304_s1 + $0x168] sm:$0xff] }
 0xc73   :  { %3532 = vmatpush3.bf16.xpose.msk.msra.mxu1 %vm3863_vm10, %v4020_v10 }
 0xc74   :  { %3534 = vmatprep.subr.bf16.mxu1 %v4130_v37 }
 0xc7a   :  { %3325 = vmatmul.mubr.msk.f32.vlgmr.msra.gmra.mrb[18].mxu1 %vm174_vm3, %v2171_v34 }
 0xc7b   :  { %3536 = vmatpush3.bf16.msra.mxu1 %v4130_v37 }
 0xd4d   :  { %v3326_v16 = vpop.f32.mrb[18].mxu1 }
 0xd4e   :  { %v2254_v17 = vmul.f32 0.35355338, %v3326_v16  ;;  %v2244_v15 = vpop.f32.mrb[19].mxu1  ;;  %v2585_v16 = vld [vmem:[%s4304_s1 + $0x170] sm:$0xff] }
 0xd4f   :  { %v2253_v18 = vmul.f32 0.35355338, %v2244_v15  ;;  %v2495_v15 = vld [vmem:[%s4304_s1 + $0x158] sm:$0xff] }
 0xd50   :  { %v2256_v19 = vadd.f32 %v2254_v17, %v3933_v40  ;;  %v3553_v17 = vpack.c.bf16 %v2585_v16, %v2584_v54 }
 0xd51   :  { %v2255_v0 = vadd.f32 %v2253_v18, %v3935_v42  ;;  %v2496_v18 = vld [vmem:[%s4304_s1 + $0x160] sm:$0xff] }
 0xd52   :  { %v2260_v63 = vsel %vm515_vm6, %v2256_v19, -inf  ;;  %3554 = vmatprep.subr.bf16.mxu1 %v3553_v17 }
 0xd53   :  { %2261 = vmax.xlane.f32.xlu0 %v2260_v63  ;;  %v2257_v10 = vsel %vm515_vm6, %v2255_v0, -inf  ;;  %v2587_v63 = vld [vmem:[%s4304_s1 + $0x180] sm:$0xff] }
 0xd54   :  { %2258 = vmax.xlane.f32.xlu1 %v2257_v10 }
 0xde0   :  { %v2262_v20 = vpop.xlane.xlu0 %2261 }
 0xde1   :  { %v2264_v8 = vsub.f32 %v2256_v19, %v2262_v20  ;;  %v2259_v13 = vpop.xlane.xlu1 %2258  ;;  %v2586_v19 = vld [vmem:[%s4304_s1 + $0x178] sm:$0xff]  ;;  %v2673_v20 = vld [vmem:[%s4304_s1 + $0x1a8] sm:$0xff] }
 0xde2   :  { %v2263_v47 = vsub.f32 %v2255_v0, %v2259_v13  ;;  %v3549_v0 = vpack.c.bf16 %v2496_v18, %v2495_v15  ;;  %v3557_v10 = vpack.c.bf16 %v2587_v63, %v2586_v19 }
 0xde3   :  { %v2267_v3 = vmul.f32 1.442695, %v2264_v8  ;;  %v2674_v8 = vld [vmem:[%s4304_s1 + $0x1b0] sm:$0xff] }
 0xde4   :  { %v2265_v37 = vmul.f32 1.442695, %v2263_v47  ;;  %v3561_v13 = vpack.c.bf16 %v2674_v8, %v2673_v20 }
 0xde5   :  { %3661 = vpow2.f32 %v2267_v3 }
 0xde6   :  { %3663 = vpow2.f32 %v2265_v37 }
 0xdef   :  { %v3662_v21 = vpop.eup %3661 }
 0xdf0   :  { %v3664_v25 = vpop.eup %3663  ;;  %v2272_v40 = vsel %vm515_vm6, %v3662_v21, 0.0 }
 0xdf1   :  { %2273 = vadd.xlane.f32.xlu0 %v2272_v40  ;;  %v2269_v42 = vsel %vm515_vm6, %v3664_v25, 0.0 }
 0xdf2   :  { %2270 = vadd.xlane.f32.xlu1 %v2269_v42  ;;  %v2484_v42 = vrot.slane %v4057_v49, %v1426_v62  ;;  %v2675_v62 = vld [vmem:[%s4304_s1 + $0x1b8] sm:$0xff] }
 0xe7e   :  { %v2274_v31 = vpop.xlane.xlu0 %2273 }
 0xe7f   :  { %3665 = vrcp.f32 %v2274_v31  ;;  %v2271_v32 = vpop.xlane.xlu1 %2270 }
 0xe80   :  { %3667 = vrcp.f32 %v2271_v32 }
 0xe89   :  { %v3666_v50 = vpop.eup %3665 }
 0xe8a   :  { %v3668_v51 = vpop.eup %3667  ;;  %v2278_v39 = vmul.f32 %v3666_v50, %v3662_v21 }
 0xe8b   :  { %v2277_v38 = vmul.f32 %v3668_v51, %v3664_v25  ;;  %v3565_v51 = vpack.c.bf16 %v2676_v14, %v2675_v62 }
 0xe8d   :  { %3331 = vmatprep.mubr.msk.f32.mxu1 %vm515_vm6, %v2277_v38  ;;  %v2669_v38 = vld [vmem:[%s4304_s1 + $0x188] sm:$0xff] }
 0xe8e   :  { %3332 = vmatmul.mubr.msk.f32.vlgmr.msra.gmra.mrb[16].mxu1 %vm515_vm6, %v2278_v39  ;;  %v2670_v39 = vld [vmem:[%s4304_s1 + $0x190] sm:$0xff] }
 0xe8f   :  { %3556 = vmatpush3.bf16.msra.mxu1 %v3553_v17 }
 0xe90   :  { %3558 = vmatprep.subr.bf16.mxu1 %v3557_v10 }
 0xe93   :  { %3560 = vmatpush3.bf16.msra.mxu1 %v3557_v10 }
 0xf61   :  { %v3333_v41 = vpop.f32.mrb[16].mxu1 }
 0xf62   :  { %v2353_v1 = vpop.f32.mrb[17].mxu1 }
 0xf63   :  { %3342 = vmatprep.mubr.msk.f32.mxu0 %vm174_vm3, %v2353_v1  ;;  %v2591_v1 = vrot.slane %v4057_v49, %v3846_v53 }
 0xf64   :  { %3343 = vmatmul.mubr.msk.f32.vlgmr.msra.gmra.mrb[16].mxu0 %vm174_vm3, %v3333_v41  ;;  %v3569_v41 = vpack.c.bf16 %v2670_v39, %v2669_v38 }
0x1037   :  { %v3344_v48 = vpop.f32.mrb[16].mxu0 }
0x1038   :  { %v2450_v52 = vadd.f32 %v3344_v48, %v2371_v44  ;;  %v2444_v55 = vpop.f32.mrb[17].mxu0 }
0x1039   :  { %v2445_v56 = vadd.f32 %v2444_v55, %v2371_v44 }
0x103a   :  { %v2454_v57 = vadd.f32 %v2450_v52, %v4070_v22 }
0x103b   :  { %v2453_v58 = vadd.f32 %v2445_v56, %v4068_v9  ;;  %v2493_v9 = vld [vmem:[%s4304_s1 + $0x148] sm:$0xff] }
0x103c   :  { %v2458_v59 = vsel %vm174_vm3, %v2454_v57, 0.0  ;;  %v3545_v34 = vpack.c.bf16 %v2494_v36, %v2493_v9 }
0x103d   :  { %2459 = vadd.xlane.f32.xlu0 %v2458_v59  ;;  %v2455_v60 = vsel %vm174_vm3, %v2453_v58, 0.0  ;;  %v2671_v59 = vld [vmem:[%s4304_s1 + $0x198] sm:$0xff] }
0x103e   :  { %2456 = vadd.xlane.f32.xlu1 %v2455_v60  ;;  %3546 = vmatprep.subr.bf16.mxu0 %v3545_v34  ;;  %v2672_v60 = vld [vmem:[%s4304_s1 + $0x1a0] sm:$0xff] }
0x103f   :  { %3548 = vmatpush3.bf16.msra.mxu0 %v3545_v34 }
0x1040   :  { %3550 = vmatprep.subr.bf16.mxu0 %v3549_v0 }
0x1043   :  { %3552 = vmatpush3.bf16.msra.mxu0 %v3549_v0 }
0x1044   :  { %3562 = vmatprep.subr.bf16.mxu0 %v3561_v13 }
0x10ca   :  { %v2460_v2 = vpop.xlane.xlu0 %2459 }
0x10cb   :  { %v2462_v4 = vmul.f32 0.03125, %v2460_v2  ;;  %v2457_v6 = vpop.xlane.xlu1 %2456 }
0x10cc   :  { %v2461_v7 = vmul.f32 0.03125, %v2457_v6 }
0x10cd   :  { %v2464_v11 = vsub.f32 %v2454_v57, %v2462_v4  ;;  %v3573_v4 = vpack.c.bf16 %v2672_v60, %v2671_v59 }
0x10ce   :  { %v2463_v12 = vsub.f32 %v2453_v58, %v2461_v7 }
0x10cf   :  { %v2466_v35 = vmul.f32 %v2464_v11, %v2464_v11 }
0x10d0   :  { %v2465_v23 = vmul.f32 %v2463_v12, %v2463_v12 }
0x10d1   :  { %v2470_v33 = vsel %vm174_vm3, %v2466_v35, 0.0 }
0x10d2   :  { %2471 = vadd.xlane.f32.xlu0 %v2470_v33  ;;  %v2467_v22 = vsel %vm174_vm3, %v2465_v23, 0.0 }
0x10d3   :  { %2468 = vadd.xlane.f32.xlu1 %v2467_v22 }
0x115f   :  { %v2472_v47 = vpop.xlane.xlu0 %2471 }
0x1160   :  { %v2474_v3 = vmul.f32 0.03125, %v2472_v47  ;;  %v2469_v37 = vpop.xlane.xlu1 %2468 }
0x1161   :  { %v2473_v21 = vmul.f32 0.03125, %v2469_v37 }
0x1162   :  { %v2476_v25 = vadd.f32 1e-05, %v2474_v3 }
0x1163   :  { %v2475_v40 = vadd.f32 1e-05, %v2473_v21 }
0x1164   :  { %3669 = vrsqrt.f32 %v2476_v25  ;;  %v165_v25 = vld [vmem:[%s4304_s1 + $0x1d8] sm:$0xff]  ;;  %s3678_s1 = scalar_lea.vmem %s2893_s23, 256 }
0x1165   :  { %3671 = vrsqrt.f32 %v2475_v40  ;;  %v2876_v40 = vrot.slane %v4057_v49, %v2370_v5  ;;  %p3679_p0 = scmp.ne.s32.totalorder %s2893_s23, %s3678_s1  ;;  %p3684_p2 = scmp.lt.s32.totalorder %s3678_s1, %s3678_s1 }
0x1167   :  { %p3685_p3 = por %p3684_p2, %p3683_p1 }
0x1169   :  { %p3686_p4 = pnand %p3685_p3, %p3679_p0 }
0x116e   :  { %v3670_v26 = vpop.eup %3669 }
0x116f   :  { %v3672_v24 = vpop.eup %3671  ;;  %v2480_v28 = vmul.f32 %v3670_v26, %v2464_v11 }
0x1170   :  { %v2479_v29 = vmul.f32 %v3672_v24, %v2463_v12  ;;  %v2842_v12 = vrot.slane %v4057_v49, %v345_v61 }
0x1171   :  { %v2486_v30 = vmul.f32 %v2484_v42, %v2480_v28 }
0x1172   :  { %v2485_v31 = vmul.f32 %v2484_v42, %v2479_v29 }
0x1173   :  { %v2492_v32 = vadd.f32 %v2490_v27, %v2486_v30 }
0x1174   :  { %v2491_v50 = vadd.f32 %v2490_v27, %v2485_v31  ;;  %v2882_v27 = vrot.slane %v165_v25, %v3827_v46 }
0x1176   :  { %3353 = vmatprep.mubr.msk.f32.mxu0 %vm174_vm3, %v2491_v50  ;;  %3364 = vmatprep.mubr.msk.f32.mxu1 %vm174_vm3, %v2491_v50 }
0x1177   :  { %3354 = vmatmul.mubr.msk.f32.vlgmr.msra.gmra.mrb[18].mxu0 %vm174_vm3, %v2492_v32  ;;  %3365 = vmatmul.mubr.msk.f32.vlgmr.msra.gmra.mrb[20].mxu1 %vm174_vm3, %v2492_v32 }
0x1178   :  { %3564 = vmatpush3.bf16.msra.mxu0 %v3561_v13 }
0x1179   :  { %3566 = vmatprep.subr.bf16.mxu0 %v3565_v51 }
0x117c   :  { %3568 = vmatpush3.bf16.msra.mxu0 %v3565_v51 }
0x117d   :  { %3570 = vmatprep.subr.bf16.mxu0 %v3569_v41 }
0x124a   :  { %v3355_v44 = vpop.f32.mrb[18].mxu0  ;;  %v3366_v48 = vpop.f32.mrb[20].mxu1 }
0x124b   :  { %v2664_v52 = vadd.f32 %v3366_v48, %v2591_v1  ;;  %v2573_v55 = vpop.f32.mrb[19].mxu0  ;;  %v2658_v56 = vpop.f32.mrb[21].mxu1  ;;  %v2579_v7 = vadd.f32 %v3355_v44, %v2500_v43 }
0x124c   :  { %v2574_v57 = vadd.f32 %v2573_v55, %v2500_v43  ;;  %v2659_v58 = vadd.f32 %v2658_v56, %v2591_v1 }
0x124d   :  { %v2668_v53 = vmax.f32 %v2664_v52, 0.0  ;;  %v2583_v11 = vmax.f32 %v2579_v7, 0.0 }
0x124e   :  { %v2667_v2 = vmax.f32 %v2659_v58, 0.0  ;;  %v2582_v6 = vmax.f32 %v2574_v57, 0.0 }
0x1250   :  { %3375 = vmatprep.mubr.msk.f32.mxu0 %vm174_vm3, %v2667_v2 }
0x1251   :  { %3376 = vmatmul.mubr.msk.f32.vlgmr.msra.gmra.mrb[20].mxu0 %vm174_vm3, %v2668_v53 }
0x1252   :  { %3572 = vmatpush3.bf16.msra.mxu0 %v3569_v41  ;;  %3386 = vmatprep.mubr.msk.f32.mxu0 %vm174_vm3, %v2582_v6 }
0x1253   :  { %3574 = vmatprep.subr.bf16.mxu0 %v3573_v4 }
0x1256   :  { %3576 = vmatpush3.bf16.msra.mxu0 %v3573_v4 }
0x1259   :  { %3387 = vmatmul.mubr.msk.f32.vlgmr.msra.gmra.mrb[20].mxu0 %vm174_vm3, %v2583_v11 }
0x132c   :  { %v3388_v35 = vpop.f32.mrb[20].mxu0 }
0x132d   :  { %v2844_v23 = vadd.f32 %v3388_v35, %v2842_v12  ;;  %v2830_v33 = vpop.f32.mrb[21].mxu0 }
0x132e   :  { %v2843_v22 = vadd.f32 %v2842_v12, %v2830_v33 }
0x132f   :  { %v2846_v9 = vadd.f32 %v2844_v23, %v2492_v32 }
0x1330   :  { %v2845_v36 = vadd.f32 %v2843_v22, %v2491_v50 }
0x1331   :  { %v2850_v54 = vsel %vm174_vm3, %v2846_v9, 0.0 }
0x1332   :  { %2851 = vadd.xlane.f32.xlu0 %v2850_v54  ;;  %v2847_v34 = vsel %vm174_vm3, %v2845_v36, 0.0 }
0x1333   :  { %2848 = vadd.xlane.f32.xlu1 %v2847_v34 }
0x13bf   :  { %v2852_v16 = vpop.xlane.xlu0 %2851 }
0x13c0   :  { %v2854_v17 = vmul.f32 0.03125, %v2852_v16  ;;  %v2849_v15 = vpop.xlane.xlu1 %2848 }
0x13c1   :  { %v2853_v18 = vmul.f32 0.03125, %v2849_v15 }
0x13c2   :  { %v2856_v19 = vsub.f32 %v2846_v9, %v2854_v17 }
0x13c3   :  { %v2855_v0 = vsub.f32 %v2845_v36, %v2853_v18 }
0x13c4   :  { %v2858_v63 = vmul.f32 %v2856_v19, %v2856_v19 }
0x13c5   :  { %v2857_v61 = vmul.f32 %v2855_v0, %v2855_v0 }
0x13c6   :  { %v2862_v10 = vsel %vm174_vm3, %v2858_v63, 0.0 }
0x13c7   :  { %2863 = vadd.xlane.f32.xlu0 %v2862_v10  ;;  %v2859_v20 = vsel %vm174_vm3, %v2857_v61, 0.0 }
0x13c8   :  { %2860 = vadd.xlane.f32.xlu1 %v2859_v20 }
0x1454   :  { %v2864_v8 = vpop.xlane.xlu0 %2863 }
0x1455   :  { %v2866_v13 = vmul.f32 0.03125, %v2864_v8  ;;  %v2861_v47 = vpop.xlane.xlu1 %2860 }
0x1456   :  { %v2865_v3 = vmul.f32 0.03125, %v2861_v47 }
0x1457   :  { %v2868_v37 = vadd.f32 1e-05, %v2866_v13 }
0x1458   :  { %v2867_v21 = vadd.f32 1e-05, %v2865_v3 }
0x1459   :  { %3673 = vrsqrt.f32 %v2868_v37 }
0x145a   :  { %3675 = vrsqrt.f32 %v2867_v21 }
0x1463   :  { %v3674_v42 = vpop.eup %3673 }
0x1464   :  { %v3676_v26 = vpop.eup %3675  ;;  %v2872_v24 = vmul.f32 %v3674_v42, %v2856_v19 }
0x1465   :  { %v2871_v28 = vmul.f32 %v3676_v26, %v2855_v0 }
0x1466   :  { %v2878_v29 = vmul.f32 %v2876_v40, %v2872_v24 }
0x1467   :  { %v2877_v30 = vmul.f32 %v2876_v40, %v2871_v28 }
0x1468   :  { %v2884_v31 = vadd.f32 %v2882_v27, %v2878_v29 }
0x1469   :  { %v2883_v32 = vadd.f32 %v2882_v27, %v2877_v30 }
0x146a   :  { %2886 = vst.msk [vmem:[#allocation2 + $0x8] sm:$0xff] %vm174_vm3, %v2884_v31 }
0x146b   :  { %2885 = vst.msk [vmem:[#allocation2] sm:$0xff] %vm174_vm3, %v2883_v32 }
0x146c   :  { %3689 = shalt.err (!%p3686_p4)
}
0x146d   :  { %s3690_s26 = scalar_lea.hbm %s4305_s2, 256 }
0x146e   :  { %p3691_p5 = scmp.ne.s32.totalorder %s4305_s2, %s3690_s26  ;;  %p3694_p6 = scmp.lt.u32.totalorder %s3690_s26, %s4305_s2 }
0x1470   :  { %p3696_p7 = pnand %p3694_p6, %p3691_p5 }
0x1472   :  { %3699 = shalt.err (!%p3696_p7)
}
0x1473   :  { %s3707_s0 = smov 128   ;;  %s3708_s3 = smov 8  }
0x1474   :  { %2898 = dma.vmem_to_hbm [thread:$0]  %s2893_s23, 256, %s4305_s2, [#allocation3], %s3707_s0, %s3707_s0, %s3708_s3  }
0x1475   :  { %3700 = dma.done.wait [#allocation3], 256  }
0x1476   :  { %3701 = vsyncadd [#allocation3], 4294967040 }
0x1477   :  { %2902 = vsyncpa [#allocation3], 1 }

</bundles_post_ra>
